<compile_context>
chip_gen: v6e
topology: v6e:2x2x1
jax: 0.10.0
libtpu: 0.0.40
codegen_flags: <defaults>
</compile_context>

<pallas_src>
import jax
import jax.numpy as jnp
from jax import lax
from jax.experimental import pallas as pl
from jax.experimental.pallas import tpu as pltpu


def nlstm_kernel(x_ref, wih_ref, whh_ref, b_ref, whw_ref, bhw_ref,
                 out_ref, pre_ref, h_ref, c_ref):
    """One grid step = one (batch block, time chunk).

    x_ref:    (Tc, Bb, D)   input chunk (compute dtype, e.g. bf16)
    wih_ref:  (D, 4H)       transposed input->hidden weights (gate order i,f,o,g)
    whh_ref:  (H, 4H)       transposed hidden->hidden weights
    b_ref:    (1, 4H)       combined bias (f32)
    whw_ref:  (H, H)        transposed highway weights
    bhw_ref:  (1, H)        highway bias (f32)
    out_ref:  (Tc, Bb, H)   output chunk (f32)
    pre_ref:  (Tc, Bb, 4H)  VMEM scratch: hoisted input projection (f32)
    h_ref, c_ref: (Bb, H)   VMEM scratch: recurrent state, persists across chunks
    """
    Tc, B, D = x_ref.shape
    H = whw_ref.shape[0]

    # Reset recurrent state at the start of each batch block's sequence.
    @pl.when(pl.program_id(1) == 0)
    def _():
        h_ref[...] = jnp.zeros_like(h_ref)
        c_ref[...] = jnp.zeros_like(c_ref)

    # Hoisted input projection: one wide MXU matmul per chunk instead of one
    # skinny matmul per timestep.  Bias folded in here so the per-step path is
    # just one matmul + gates.
    x2 = x_ref[...].reshape(Tc * B, D)
    pre_x = jnp.dot(x2, wih_ref[...], preferred_element_type=jnp.float32)
    pre_ref[...] = (pre_x + b_ref[...]).reshape(Tc, B, 4 * H)

    whh = whh_ref[...]                       # (H, 4H), compute dtype

    def step(t, carry):
        h, c = carry                         # f32 (Bb, H)
        pre = pre_ref[t] + jnp.dot(h.astype(whh.dtype), whh,
                                   preferred_element_type=jnp.float32)
        # Gate layout (i, f, o, g): one contiguous sigmoid slab + one tanh.
        sig = jax.nn.sigmoid(pre[:, :3 * H])
        i = sig[:, 0:H]
        f = sig[:, H:2 * H]
        o = sig[:, 2 * H:3 * H]
        g = jnp.tanh(pre[:, 3 * H:])
        c_new = f * c + i * g
        h_new = o * jnp.tanh(c_new)
        out_ref[t] = h_new                   # lstm output for this timestep
        return h_new, c_new

    # Unrolled: Tc is a small static trip-count; gives the LLO scheduler full
    # visibility to interleave the skinny matmul with the gate VPU/EUP work.
    h_fin, c_fin = lax.fori_loop(0, Tc, step, (h_ref[...], c_ref[...]),
                                 unroll=True)
    h_ref[...] = h_fin
    c_ref[...] = c_fin

    # Fused highway epilogue on this chunk, in place:
    #   out = lstm_out + relu(lstm_out @ W_hw^T + b_hw)
    lo = out_ref[...].reshape(Tc * B, H)
    hw = jnp.maximum(
        jnp.dot(lo.astype(whw_ref.dtype), whw_ref[...],
                preferred_element_type=jnp.float32) + bhw_ref[...], 0.0)
    out_ref[...] = (lo + hw).reshape(Tc, B, H)


def _round_up(v, m):
    return (v + m - 1) // m * m


def _pack_gate_mat(mat, H, Hp, pad_cols):
    """(4H, C) torch gate order (i,f,g,o) -> (4Hp, pad_cols), order (i,f,o,g)."""
    C = mat.shape[1]
    i, f, g, o = (mat[k * H:(k + 1) * H] for k in range(4))
    blocks = [jnp.pad(blk, ((0, Hp - H), (0, pad_cols - C)))
              for blk in (i, f, o, g)]
    return jnp.concatenate(blocks, axis=0)


def _pack_gate_vec(vec, H, Hp):
    """(4H,) torch gate order (i,f,g,o) -> (4Hp,), order (i,f,o,g)."""
    i, f, g, o = (vec[k * H:(k + 1) * H] for k in range(4))
    return jnp.concatenate([jnp.pad(blk, (0, Hp - H)) for blk in (i, f, o, g)])


def nlstm_forward(x, params, *, time_chunk=8, batch_blocks=1,
                  compute_dtype=jnp.bfloat16):
    """x: (B, T, D) float32 -> (B, T, H) float32.

    compute_dtype: dtype of the MXU operands (weights / x / h for the dots).
    Accumulation and all gate/state math stay in float32.
    """
    B, T, D = x.shape
    H = params["highway_w"].shape[0]

    # Hardware-aligned padded sizes (zero padding is semantics preserving:
    # padded lanes of W/b are zero, padded batch rows are ignored at the end).
    Hp = _round_up(H, 128)                   # lanes
    Dp = _round_up(D, 128)                   # lanes
    Bp = _round_up(B, 16 * batch_blocks)     # sublanes (16 covers bf16 packing)
    Bblk = Bp // batch_blocks
    Tc = max(1, min(time_chunk, T))
    n_chunks = pl.cdiv(T, Tc)
    Tp = n_chunks * Tc

    cd = compute_dtype

    # Parameters: reorder gates to (i,f,o,g), pad, transpose for row-major dots.
    wih_t = _pack_gate_mat(params["weight_ih"], H, Hp, Dp).T.astype(cd)   # (Dp,4Hp)
    whh_t = _pack_gate_mat(params["weight_hh"], H, Hp, Hp).T.astype(cd)   # (Hp,4Hp)
    b = _pack_gate_vec(params["bias_ih"] + params["bias_hh"], H, Hp)[None, :]
    b = b.astype(jnp.float32)                                             # (1,4Hp)
    whw_t = jnp.pad(params["highway_w"],
                    ((0, Hp - H), (0, Hp - H))).T.astype(cd)              # (Hp,Hp)
    bhw = jnp.pad(params["highway_b"], (0, Hp - H))[None, :].astype(jnp.float32)

    # Input: cast to compute dtype first (pad/transpose at half the bytes for
    # bf16), then pad and go time-major so the chunk axis is leading.
    x_p = jnp.pad(x.astype(cd), ((0, Bp - B), (0, Tp - T), (0, Dp - D)))
    x_tm = jnp.transpose(x_p, (1, 0, 2))                                  # (Tp,Bp,Dp)

    # Explicit VMEM budget (double-buffered streams + weights + scratch).
    cd_b = jnp.dtype(cd).itemsize
    est = (2 * Tc * Bblk * Dp * cd_b                          # x chunk (x2 buffers)
           + 2 * Tc * Bblk * Hp * 4                           # out chunk (x2 buffers)
           + 2 * (Dp * 4 * Hp + Hp * 4 * Hp + Hp * Hp) * cd_b  # weights
           + 2 * (4 * Hp + Hp) * 4                            # biases
           + Tc * Bblk * 4 * Hp * 4                           # pre scratch
           + 2 * Bblk * Hp * 4)                               # h, c
    vmem_limit = min(max(est + (4 << 20), 16 << 20), 64 << 20)

    out_tm = pl.pallas_call(
        nlstm_kernel,
        out_shape=jax.ShapeDtypeStruct((Tp, Bp, Hp), jnp.float32),
        grid=(batch_blocks, n_chunks),
        in_specs=[
            pl.BlockSpec((Tc, Bblk, Dp), lambda nb, c: (c, nb, 0)),
            pl.BlockSpec((Dp, 4 * Hp), lambda nb, c: (0, 0)),
            pl.BlockSpec((Hp, 4 * Hp), lambda nb, c: (0, 0)),
            pl.BlockSpec((1, 4 * Hp), lambda nb, c: (0, 0)),
            pl.BlockSpec((Hp, Hp), lambda nb, c: (0, 0)),
            pl.BlockSpec((1, Hp), lambda nb, c: (0, 0)),
        ],
        out_specs=pl.BlockSpec((Tc, Bblk, Hp), lambda nb, c: (c, nb, 0)),
        scratch_shapes=[
            pltpu.VMEM((Tc, Bblk, 4 * Hp), jnp.float32),   # hoisted projection
            pltpu.VMEM((Bblk, Hp), jnp.float32),           # h
            pltpu.VMEM((Bblk, Hp), jnp.float32),           # c
        ],
        compiler_params=pltpu.CompilerParams(
            dimension_semantics=("parallel", "arbitrary"),
            vmem_limit_bytes=vmem_limit),
    )(x_tm, wih_t, whh_t, b, whw_t, bhw)

    out = jnp.transpose(out_tm, (1, 0, 2))                 # (Bp, Tp, Hp)
    return out[:B, :T, :H]


def nlstm_reference(x, params):
    """Pure-JAX reference matching torch.nn.LSTM + Linear semantics (f32)."""
    H = params["weight_hh"].shape[1]
    wih_t = params["weight_ih"].T
    whh_t = params["weight_hh"].T
    b = params["bias_ih"] + params["bias_hh"]

    def cell(carry, x_t):
        h, c = carry
        pre = x_t @ wih_t + h @ whh_t + b
        i = jax.nn.sigmoid(pre[:, 0:H])
        f = jax.nn.sigmoid(pre[:, H:2 * H])
        g = jnp.tanh(pre[:, 2 * H:3 * H])
        o = jax.nn.sigmoid(pre[:, 3 * H:4 * H])
        c = f * c + i * g
        h = o * jnp.tanh(c)
        return (h, c), h

    B = x.shape[0]
    h0 = jnp.zeros((B, H), jnp.float32)
    c0 = jnp.zeros((B, H), jnp.float32)
    _, hs = lax.scan(cell, (h0, c0), jnp.transpose(x, (1, 0, 2)))
    lstm_out = jnp.transpose(hs, (1, 0, 2))                # (B, T, H)
    hw = jnp.maximum(lstm_out @ params["highway_w"].T + params["highway_b"], 0.0)
    return lstm_out + hw


def init_params(key, input_size, hidden_size):
    bound = 1.0 / jnp.sqrt(hidden_size)
    ks = jax.random.split(key, 6)
    u = lambda k, shape: jax.random.uniform(
        k, shape, jnp.float32, minval=-bound, maxval=bound)
    return {
        "weight_ih": u(ks[0], (4 * hidden_size, input_size)),
        "weight_hh": u(ks[1], (4 * hidden_size, hidden_size)),
        "bias_ih":   u(ks[2], (4 * hidden_size,)),
        "bias_hh":   u(ks[3], (4 * hidden_size,)),
        "highway_w": u(ks[4], (hidden_size, hidden_size)),
        "highway_b": u(ks[5], (hidden_size,)),
    }


if __name__ == "__main__":
    B, T, D, H = 2, 8, 4, 32
    key = jax.random.PRNGKey(0)
    k_x, k_p = jax.random.split(key)
    x = jax.random.normal(k_x, (B, T, D), jnp.float32)
    params = init_params(k_p, D, H)

    ref = nlstm_reference(x, params)

    # f32 MXU path: tight check of padding / gate reorder / chunked recurrence
    # (time_chunk=4 -> two chunks, exercising state carry across grid steps).
    out_f32 = nlstm_forward(x, params, time_chunk=4,
                            compute_dtype=jnp.float32)
    jax.block_until_ready(out_f32)
    assert out_f32.shape == (B, T, H)
    assert jnp.allclose(out_f32, ref, atol=1e-4, rtol=1e-4), "f32 mismatch"

    # bf16 MXU operands (f32 accumulation / gates): performance configuration.
    out_bf16 = nlstm_forward(x, params, time_chunk=4,
                             compute_dtype=jnp.bfloat16)
    jax.block_until_ready(out_bf16)
    assert out_bf16.shape == (B, T, H)
    assert jnp.allclose(out_bf16, ref, atol=5e-2, rtol=5e-2), "bf16 mismatch"

    print("KERNEL_OK")
</pallas_src>

<mosaic_0001>
module attributes {stable_mosaic.version = 11 : i64} {
  func.func @nlstm_kernel(%arg0: i32, %arg1: i32, %arg2: memref<4x16x128xf32, #tpu.memory_space<vmem>>, %arg3: memref<128x512xf32, #tpu.memory_space<vmem>>, %arg4: memref<128x512xf32, #tpu.memory_space<vmem>>, %arg5: memref<1x512xf32, #tpu.memory_space<vmem>>, %arg6: memref<128x128xf32, #tpu.memory_space<vmem>>, %arg7: memref<1x128xf32, #tpu.memory_space<vmem>>, %arg8: memref<4x16x128xf32, #tpu.memory_space<vmem>>, %arg9: memref<4x16x512xf32, #tpu.memory_space<vmem>>, %arg10: memref<16x128xf32, #tpu.memory_space<vmem>>, %arg11: memref<16x128xf32, #tpu.memory_space<vmem>>) attributes {dimension_semantics = [#tpu.dimension_semantics<parallel>, #tpu.dimension_semantics<arbitrary>], iteration_bounds = array<i64: 1, 2>, scalar_prefetch = 0 : i64, scratch_operands = 3 : i64, tpu.core_type = #tpu.core_type<tc>, window_params = [{transform_indices = @transform_0, window_bounds = array<i64: 4, 16, 128>}, {pipeline_mode = #tpu.pipeline_mode<synchronous>, transform_indices = @transform_1, window_bounds = array<i64: 128, 512>}, {pipeline_mode = #tpu.pipeline_mode<synchronous>, transform_indices = @transform_2, window_bounds = array<i64: 128, 512>}, {pipeline_mode = #tpu.pipeline_mode<synchronous>, transform_indices = @transform_3, window_bounds = array<i64: 1, 512>}, {pipeline_mode = #tpu.pipeline_mode<synchronous>, transform_indices = @transform_4, window_bounds = array<i64: 128, 128>}, {pipeline_mode = #tpu.pipeline_mode<synchronous>, transform_indices = @transform_5, window_bounds = array<i64: 1, 128>}, {transform_indices = @transform_6, window_bounds = array<i64: 4, 16, 128>}]} {
    %c0_i32 = arith.constant 0 : i32
    %0 = arith.cmpi eq, %arg1, %c0_i32 : i32
    %1 = arith.extui %0 : i1 to i32
    %c0_i32_0 = arith.constant 0 : i32
    %2 = arith.cmpi ne, %1, %c0_i32_0 : i32
    scf.if %2 {
      %cst_57 = arith.constant 0.000000e+00 : f32
      %129 = vector.broadcast %cst_57 : f32 to vector<16x128xf32>
      %c0_58 = arith.constant 0 : index
      %c0_59 = arith.constant 0 : index
      %130 = vector.load %arg10[%c0_58, %c0_59] : memref<16x128xf32, #tpu.memory_space<vmem>>, vector<16x128xf32>
      tpu.vector_store %arg10[%c0_58, %c0_59], %129 {strides = array<i32>} : memref<16x128xf32, #tpu.memory_space<vmem>>, vector<16x128xf32>,
      %cst_60 = arith.constant 0.000000e+00 : f32
      %131 = vector.broadcast %cst_60 : f32 to vector<16x128xf32>
      %c0_61 = arith.constant 0 : index
      %c0_62 = arith.constant 0 : index
      %132 = vector.load %arg11[%c0_61, %c0_62] : memref<16x128xf32, #tpu.memory_space<vmem>>, vector<16x128xf32>
      tpu.vector_store %arg11[%c0_61, %c0_62], %131 {strides = array<i32>} : memref<16x128xf32, #tpu.memory_space<vmem>>, vector<16x128xf32>,
    } else {
    }
    %c0 = arith.constant 0 : index
    %c0_1 = arith.constant 0 : index
    %c0_2 = arith.constant 0 : index
    %3 = vector.load %arg2[%c0, %c0_1, %c0_2] : memref<4x16x128xf32, #tpu.memory_space<vmem>>, vector<4x16x128xf32>
    %4 = vector.shape_cast %3 : vector<4x16x128xf32> to vector<64x128xf32>
    %c0_3 = arith.constant 0 : index
    %c0_4 = arith.constant 0 : index
    %5 = vector.load %arg3[%c0_3, %c0_4] : memref<128x512xf32, #tpu.memory_space<vmem>>, vector<128x512xf32>
    %cst = arith.constant dense<0.000000e+00> : vector<64x512xf32>
    %6 = tpu.matmul %4, %5, %cst {dimension_numbers = #tpu.dot_dimension_numbers<[1], [0], [0], [1], [0, 0, 1, 1], [], []>} : vector<64x128xf32>, vector<128x512xf32>, vector<64x512xf32> -> vector<64x512xf32>
    %c0_5 = arith.constant 0 : index
    %c0_6 = arith.constant 0 : index
    %7 = vector.load %arg5[%c0_5, %c0_6] : memref<1x512xf32, #tpu.memory_space<vmem>>, vector<1x512xf32>
    %8 = vector.broadcast %7 : vector<1x512xf32> to vector<64x512xf32>
    %9 = arith.addf %6, %8 : vector<64x512xf32>
    %10 = vector.shape_cast %9 : vector<64x512xf32> to vector<4x16x512xf32>
    %c0_7 = arith.constant 0 : index
    %c0_8 = arith.constant 0 : index
    %c0_9 = arith.constant 0 : index
    %11 = vector.load %arg9[%c0_7, %c0_8, %c0_9] : memref<4x16x512xf32, #tpu.memory_space<vmem>>, vector<4x16x512xf32>
    tpu.vector_store %arg9[%c0_7, %c0_8, %c0_9], %10 {strides = array<i32>} : memref<4x16x512xf32, #tpu.memory_space<vmem>>, vector<4x16x512xf32>,
    %c0_10 = arith.constant 0 : index
    %c0_11 = arith.constant 0 : index
    %12 = vector.load %arg4[%c0_10, %c0_11] : memref<128x512xf32, #tpu.memory_space<vmem>>, vector<128x512xf32>
    %c0_12 = arith.constant 0 : index
    %c0_13 = arith.constant 0 : index
    %13 = vector.load %arg10[%c0_12, %c0_13] : memref<16x128xf32, #tpu.memory_space<vmem>>, vector<16x128xf32>
    %c0_14 = arith.constant 0 : index
    %c0_15 = arith.constant 0 : index
    %14 = vector.load %arg11[%c0_14, %c0_15] : memref<16x128xf32, #tpu.memory_space<vmem>>, vector<16x128xf32>
    %c0_i32_16 = arith.constant 0 : i32
    %15 = arith.index_cast %c0_i32_16 : i32 to index
    %c0_17 = arith.constant 0 : index
    %c0_18 = arith.constant 0 : index
    %16 = vector.load %arg9[%15, %c0_17, %c0_18] : memref<4x16x512xf32, #tpu.memory_space<vmem>>, vector<1x16x512xf32>
    %17 = vector.shape_cast %16 : vector<1x16x512xf32> to vector<16x512xf32>
    %cst_19 = arith.constant dense<0.000000e+00> : vector<16x512xf32>
    %18 = tpu.matmul %13, %12, %cst_19 {dimension_numbers = #tpu.dot_dimension_numbers<[1], [0], [0], [1], [0, 0, 1, 1], [], []>} : vector<16x128xf32>, vector<128x512xf32>, vector<16x512xf32> -> vector<16x512xf32>
    %19 = arith.addf %17, %18 : vector<16x512xf32>
    %20 = vector.extract_strided_slice %19 {offsets = [0, 0], sizes = [16, 384], strides = [1, 1]} : vector<16x512xf32> to vector<16x384xf32>
    %21 = arith.negf %20 : vector<16x384xf32>
    %22 = math.exp %21 : vector<16x384xf32>
    %cst_20 = arith.constant 1.000000e+00 : f32
    %23 = vector.broadcast %cst_20 : f32 to vector<16x384xf32>
    %24 = arith.addf %23, %22 : vector<16x384xf32>
    %25 = arith.divf %23, %24 : vector<16x384xf32>
    %26 = vector.extract_strided_slice %25 {offsets = [0, 0], sizes = [16, 128], strides = [1, 1]} : vector<16x384xf32> to vector<16x128xf32>
    %27 = vector.extract_strided_slice %25 {offsets = [0, 128], sizes = [16, 128], strides = [1, 1]} : vector<16x384xf32> to vector<16x128xf32>
    %28 = vector.extract_strided_slice %25 {offsets = [0, 256], sizes = [16, 128], strides = [1, 1]} : vector<16x384xf32> to vector<16x128xf32>
    %29 = vector.extract_strided_slice %19 {offsets = [0, 384], sizes = [16, 128], strides = [1, 1]} : vector<16x512xf32> to vector<16x128xf32>
    %30 = math.tanh %29 : vector<16x128xf32>
    %31 = arith.mulf %27, %14 : vector<16x128xf32>
    %32 = arith.mulf %26, %30 : vector<16x128xf32>
    %33 = arith.addf %31, %32 : vector<16x128xf32>
    %34 = math.tanh %33 : vector<16x128xf32>
    %35 = arith.mulf %28, %34 : vector<16x128xf32>
    %36 = arith.index_cast %c0_i32_16 : i32 to index
    %c0_21 = arith.constant 0 : index
    %c0_22 = arith.constant 0 : index
    %37 = vector.load %arg8[%36, %c0_21, %c0_22] : memref<4x16x128xf32, #tpu.memory_space<vmem>>, vector<1x16x128xf32>
    %38 = vector.shape_cast %37 : vector<1x16x128xf32> to vector<16x128xf32>
    %39 = vector.shape_cast %35 : vector<16x128xf32> to vector<1x16x128xf32>
    tpu.vector_store %arg8[%36, %c0_21, %c0_22], %39 {strides = array<i32>} : memref<4x16x128xf32, #tpu.memory_space<vmem>>, vector<1x16x128xf32>,
    %c1_i32 = arith.constant 1 : i32
    %40 = arith.index_cast %c1_i32 : i32 to index
    %c0_23 = arith.constant 0 : index
    %c0_24 = arith.constant 0 : index
    %41 = vector.load %arg9[%40, %c0_23, %c0_24] : memref<4x16x512xf32, #tpu.memory_space<vmem>>, vector<1x16x512xf32>
    %42 = vector.shape_cast %41 : vector<1x16x512xf32> to vector<16x512xf32>
    %cst_25 = arith.constant dense<0.000000e+00> : vector<16x512xf32>
    %43 = tpu.matmul %35, %12, %cst_25 {dimension_numbers = #tpu.dot_dimension_numbers<[1], [0], [0], [1], [0, 0, 1, 1], [], []>} : vector<16x128xf32>, vector<128x512xf32>, vector<16x512xf32> -> vector<16x512xf32>
    %44 = arith.addf %42, %43 : vector<16x512xf32>
    %45 = vector.extract_strided_slice %44 {offsets = [0, 0], sizes = [16, 384], strides = [1, 1]} : vector<16x512xf32> to vector<16x384xf32>
    %46 = arith.negf %45 : vector<16x384xf32>
    %47 = math.exp %46 : vector<16x384xf32>
    %cst_26 = arith.constant 1.000000e+00 : f32
    %48 = vector.broadcast %cst_26 : f32 to vector<16x384xf32>
    %49 = arith.addf %48, %47 : vector<16x384xf32>
    %50 = arith.divf %48, %49 : vector<16x384xf32>
    %51 = vector.extract_strided_slice %50 {offsets = [0, 0], sizes = [16, 128], strides = [1, 1]} : vector<16x384xf32> to vector<16x128xf32>
    %52 = vector.extract_strided_slice %50 {offsets = [0, 128], sizes = [16, 128], strides = [1, 1]} : vector<16x384xf32> to vector<16x128xf32>
    %53 = vector.extract_strided_slice %50 {offsets = [0, 256], sizes = [16, 128], strides = [1, 1]} : vector<16x384xf32> to vector<16x128xf32>
    %54 = vector.extract_strided_slice %44 {offsets = [0, 384], sizes = [16, 128], strides = [1, 1]} : vector<16x512xf32> to vector<16x128xf32>
    %55 = math.tanh %54 : vector<16x128xf32>
    %56 = arith.mulf %52, %33 : vector<16x128xf32>
    %57 = arith.mulf %51, %55 : vector<16x128xf32>
    %58 = arith.addf %56, %57 : vector<16x128xf32>
    %59 = math.tanh %58 : vector<16x128xf32>
    %60 = arith.mulf %53, %59 : vector<16x128xf32>
    %61 = arith.index_cast %c1_i32 : i32 to index
    %c0_27 = arith.constant 0 : index
    %c0_28 = arith.constant 0 : index
    %62 = vector.load %arg8[%61, %c0_27, %c0_28] : memref<4x16x128xf32, #tpu.memory_space<vmem>>, vector<1x16x128xf32>
    %63 = vector.shape_cast %62 : vector<1x16x128xf32> to vector<16x128xf32>
    %64 = vector.shape_cast %60 : vector<16x128xf32> to vector<1x16x128xf32>
    tpu.vector_store %arg8[%61, %c0_27, %c0_28], %64 {strides = array<i32>} : memref<4x16x128xf32, #tpu.memory_space<vmem>>, vector<1x16x128xf32>,
    %c2_i32 = arith.constant 2 : i32
    %65 = arith.index_cast %c2_i32 : i32 to index
    %c0_29 = arith.constant 0 : index
    %c0_30 = arith.constant 0 : index
    %66 = vector.load %arg9[%65, %c0_29, %c0_30] : memref<4x16x512xf32, #tpu.memory_space<vmem>>, vector<1x16x512xf32>
    %67 = vector.shape_cast %66 : vector<1x16x512xf32> to vector<16x512xf32>
    %cst_31 = arith.constant dense<0.000000e+00> : vector<16x512xf32>
    %68 = tpu.matmul %60, %12, %cst_31 {dimension_numbers = #tpu.dot_dimension_numbers<[1], [0], [0], [1], [0, 0, 1, 1], [], []>} : vector<16x128xf32>, vector<128x512xf32>, vector<16x512xf32> -> vector<16x512xf32>
    %69 = arith.addf %67, %68 : vector<16x512xf32>
    %70 = vector.extract_strided_slice %69 {offsets = [0, 0], sizes = [16, 384], strides = [1, 1]} : vector<16x512xf32> to vector<16x384xf32>
    %71 = arith.negf %70 : vector<16x384xf32>
    %72 = math.exp %71 : vector<16x384xf32>
    %cst_32 = arith.constant 1.000000e+00 : f32
    %73 = vector.broadcast %cst_32 : f32 to vector<16x384xf32>
    %74 = arith.addf %73, %72 : vector<16x384xf32>
    %75 = arith.divf %73, %74 : vector<16x384xf32>
    %76 = vector.extract_strided_slice %75 {offsets = [0, 0], sizes = [16, 128], strides = [1, 1]} : vector<16x384xf32> to vector<16x128xf32>
    %77 = vector.extract_strided_slice %75 {offsets = [0, 128], sizes = [16, 128], strides = [1, 1]} : vector<16x384xf32> to vector<16x128xf32>
    %78 = vector.extract_strided_slice %75 {offsets = [0, 256], sizes = [16, 128], strides = [1, 1]} : vector<16x384xf32> to vector<16x128xf32>
    %79 = vector.extract_strided_slice %69 {offsets = [0, 384], sizes = [16, 128], strides = [1, 1]} : vector<16x512xf32> to vector<16x128xf32>
    %80 = math.tanh %79 : vector<16x128xf32>
    %81 = arith.mulf %77, %58 : vector<16x128xf32>
    %82 = arith.mulf %76, %80 : vector<16x128xf32>
    %83 = arith.addf %81, %82 : vector<16x128xf32>
    %84 = math.tanh %83 : vector<16x128xf32>
    %85 = arith.mulf %78, %84 : vector<16x128xf32>
    %86 = arith.index_cast %c2_i32 : i32 to index
    %c0_33 = arith.constant 0 : index
    %c0_34 = arith.constant 0 : index
    %87 = vector.load %arg8[%86, %c0_33, %c0_34] : memref<4x16x128xf32, #tpu.memory_space<vmem>>, vector<1x16x128xf32>
    %88 = vector.shape_cast %87 : vector<1x16x128xf32> to vector<16x128xf32>
    %89 = vector.shape_cast %85 : vector<16x128xf32> to vector<1x16x128xf32>
    tpu.vector_store %arg8[%86, %c0_33, %c0_34], %89 {strides = array<i32>} : memref<4x16x128xf32, #tpu.memory_space<vmem>>, vector<1x16x128xf32>,
    %c3_i32 = arith.constant 3 : i32
    %90 = arith.index_cast %c3_i32 : i32 to index
    %c0_35 = arith.constant 0 : index
    %c0_36 = arith.constant 0 : index
    %91 = vector.load %arg9[%90, %c0_35, %c0_36] : memref<4x16x512xf32, #tpu.memory_space<vmem>>, vector<1x16x512xf32>
    %92 = vector.shape_cast %91 : vector<1x16x512xf32> to vector<16x512xf32>
    %cst_37 = arith.constant dense<0.000000e+00> : vector<16x512xf32>
    %93 = tpu.matmul %85, %12, %cst_37 {dimension_numbers = #tpu.dot_dimension_numbers<[1], [0], [0], [1], [0, 0, 1, 1], [], []>} : vector<16x128xf32>, vector<128x512xf32>, vector<16x512xf32> -> vector<16x512xf32>
    %94 = arith.addf %92, %93 : vector<16x512xf32>
    %95 = vector.extract_strided_slice %94 {offsets = [0, 0], sizes = [16, 384], strides = [1, 1]} : vector<16x512xf32> to vector<16x384xf32>
    %96 = arith.negf %95 : vector<16x384xf32>
    %97 = math.exp %96 : vector<16x384xf32>
    %cst_38 = arith.constant 1.000000e+00 : f32
    %98 = vector.broadcast %cst_38 : f32 to vector<16x384xf32>
    %99 = arith.addf %98, %97 : vector<16x384xf32>
    %100 = arith.divf %98, %99 : vector<16x384xf32>
    %101 = vector.extract_strided_slice %100 {offsets = [0, 0], sizes = [16, 128], strides = [1, 1]} : vector<16x384xf32> to vector<16x128xf32>
    %102 = vector.extract_strided_slice %100 {offsets = [0, 128], sizes = [16, 128], strides = [1, 1]} : vector<16x384xf32> to vector<16x128xf32>
    %103 = vector.extract_strided_slice %100 {offsets = [0, 256], sizes = [16, 128], strides = [1, 1]} : vector<16x384xf32> to vector<16x128xf32>
    %104 = vector.extract_strided_slice %94 {offsets = [0, 384], sizes = [16, 128], strides = [1, 1]} : vector<16x512xf32> to vector<16x128xf32>
    %105 = math.tanh %104 : vector<16x128xf32>
    %106 = arith.mulf %102, %83 : vector<16x128xf32>
    %107 = arith.mulf %101, %105 : vector<16x128xf32>
    %108 = arith.addf %106, %107 : vector<16x128xf32>
    %109 = math.tanh %108 : vector<16x128xf32>
    %110 = arith.mulf %103, %109 : vector<16x128xf32>
    %111 = arith.index_cast %c3_i32 : i32 to index
    %c0_39 = arith.constant 0 : index
    %c0_40 = arith.constant 0 : index
    %112 = vector.load %arg8[%111, %c0_39, %c0_40] : memref<4x16x128xf32, #tpu.memory_space<vmem>>, vector<1x16x128xf32>
    %113 = vector.shape_cast %112 : vector<1x16x128xf32> to vector<16x128xf32>
    %114 = vector.shape_cast %110 : vector<16x128xf32> to vector<1x16x128xf32>
    tpu.vector_store %arg8[%111, %c0_39, %c0_40], %114 {strides = array<i32>} : memref<4x16x128xf32, #tpu.memory_space<vmem>>, vector<1x16x128xf32>,
    %c4_i32 = arith.constant 4 : i32
    %c0_41 = arith.constant 0 : index
    %c0_42 = arith.constant 0 : index
    %115 = vector.load %arg10[%c0_41, %c0_42] : memref<16x128xf32, #tpu.memory_space<vmem>>, vector<16x128xf32>
    tpu.vector_store %arg10[%c0_41, %c0_42], %110 {strides = array<i32>} : memref<16x128xf32, #tpu.memory_space<vmem>>, vector<16x128xf32>,
    %c0_43 = arith.constant 0 : index
    %c0_44 = arith.constant 0 : index
    %116 = vector.load %arg11[%c0_43, %c0_44] : memref<16x128xf32, #tpu.memory_space<vmem>>, vector<16x128xf32>
    tpu.vector_store %arg11[%c0_43, %c0_44], %108 {strides = array<i32>} : memref<16x128xf32, #tpu.memory_space<vmem>>, vector<16x128xf32>,
    %c0_45 = arith.constant 0 : index
    %c0_46 = arith.constant 0 : index
    %c0_47 = arith.constant 0 : index
    %117 = vector.load %arg8[%c0_45, %c0_46, %c0_47] : memref<4x16x128xf32, #tpu.memory_space<vmem>>, vector<4x16x128xf32>
    %118 = vector.shape_cast %117 : vector<4x16x128xf32> to vector<64x128xf32>
    %c0_48 = arith.constant 0 : index
    %c0_49 = arith.constant 0 : index
    %119 = vector.load %arg6[%c0_48, %c0_49] : memref<128x128xf32, #tpu.memory_space<vmem>>, vector<128x128xf32>
    %cst_50 = arith.constant dense<0.000000e+00> : vector<64x128xf32>
    %120 = tpu.matmul %118, %119, %cst_50 {dimension_numbers = #tpu.dot_dimension_numbers<[1], [0], [0], [1], [0, 0, 1, 1], [], []>} : vector<64x128xf32>, vector<128x128xf32>, vector<64x128xf32> -> vector<64x128xf32>
    %c0_51 = arith.constant 0 : index
    %c0_52 = arith.constant 0 : index
    %121 = vector.load %arg7[%c0_51, %c0_52] : memref<1x128xf32, #tpu.memory_space<vmem>>, vector<1x128xf32>
    %122 = vector.broadcast %121 : vector<1x128xf32> to vector<64x128xf32>
    %123 = arith.addf %120, %122 : vector<64x128xf32>
    %cst_53 = arith.constant 0.000000e+00 : f32
    %124 = vector.broadcast %cst_53 : f32 to vector<64x128xf32>
    %125 = arith.maximumf %123, %124 : vector<64x128xf32>
    %126 = arith.addf %118, %125 : vector<64x128xf32>
    %127 = vector.shape_cast %126 : vector<64x128xf32> to vector<4x16x128xf32>
    %c0_54 = arith.constant 0 : index
    %c0_55 = arith.constant 0 : index
    %c0_56 = arith.constant 0 : index
    %128 = vector.load %arg8[%c0_54, %c0_55, %c0_56] : memref<4x16x128xf32, #tpu.memory_space<vmem>>, vector<4x16x128xf32>
    tpu.vector_store %arg8[%c0_54, %c0_55, %c0_56], %127 {strides = array<i32>} : memref<4x16x128xf32, #tpu.memory_space<vmem>>, vector<4x16x128xf32>,
    return
  }
  func.func @transform_0(%arg0: i32, %arg1: i32) -> (i32, i32, i32) {
    %c0_i32 = arith.constant 0 : i32
    %c0_i32_0 = arith.constant 0 : i32
    return %arg1, %arg0, %c0_i32 : i32, i32, i32
  }
  func.func @transform_1(%arg0: i32, %arg1: i32) -> (i32, i32) {
    %c0_i32 = arith.constant 0 : i32
    %c0_i32_0 = arith.constant 0 : i32
    %c0_i32_1 = arith.constant 0 : i32
    return %c0_i32, %c0_i32_0 : i32, i32
  }
  func.func @transform_2(%arg0: i32, %arg1: i32) -> (i32, i32) {
    %c0_i32 = arith.constant 0 : i32
    %c0_i32_0 = arith.constant 0 : i32
    %c0_i32_1 = arith.constant 0 : i32
    return %c0_i32, %c0_i32_0 : i32, i32
  }
  func.func @transform_3(%arg0: i32, %arg1: i32) -> (i32, i32) {
    %c0_i32 = arith.constant 0 : i32
    %c0_i32_0 = arith.constant 0 : i32
    %c0_i32_1 = arith.constant 0 : i32
    return %c0_i32, %c0_i32_0 : i32, i32
  }
  func.func @transform_4(%arg0: i32, %arg1: i32) -> (i32, i32) {
    %c0_i32 = arith.constant 0 : i32
    %c0_i32_0 = arith.constant 0 : i32
    %c0_i32_1 = arith.constant 0 : i32
    return %c0_i32, %c0_i32_0 : i32, i32
  }
  func.func @transform_5(%arg0: i32, %arg1: i32) -> (i32, i32) {
    %c0_i32 = arith.constant 0 : i32
    %c0_i32_0 = arith.constant 0 : i32
    %c0_i32_1 = arith.constant 0 : i32
    return %c0_i32, %c0_i32_0 : i32, i32
  }
  func.func @transform_6(%arg0: i32, %arg1: i32) -> (i32, i32, i32) {
    %c0_i32 = arith.constant 0 : i32
    %c0_i32_0 = arith.constant 0 : i32
    return %arg1, %arg0, %c0_i32 : i32, i32, i32
  }
}

</mosaic_0001>

<bundles_post_ra>
// kernel: tpu_custom_call.1
= control target key start
LH: loop header
LB: loop body
LE: loop exit
PB: predicated region body
PF: predicated region fallthrough
CT: control target
= control target key end

     0   :  { %s3399_s0 = inlined_call_operand.hbm [shape: f32[8,16,128], index: 0, kind: input, shape index: {}]   ;;  %s3400_s1 = inlined_call_operand.hbm [shape: f32[128,512], index: 1, kind: input, shape index: {}]   ;;  %s3401_s2 = inlined_call_operand.hbm [shape: f32[128,512], index: 2, kind: input, shape index: {}]   ;;  %s3402_s3 = inlined_call_operand.vmem [shape: f32[1,512], index: 3, kind: input, shape index: {}]   ;;  %s3403_s4 = inlined_call_operand.hbm [shape: f32[128,128], index: 4, kind: input, shape index: {}]   ;;  %s3404_s5 = inlined_call_operand.vmem [shape: f32[1,128], index: 5, kind: input, shape index: {}]   ;;  %s3405_s6 = inlined_call_operand.hbm [shape: f32[8,16,128], index: 6, kind: output, shape index: {}]  }
   0x1   :  { %3458 = sst [smem:[#allocation64_spill]] %s3400_s1 }
   0x2   :  { %3459 = sst [smem:[#allocation65_spill]] %s3401_s2 }
   0x3   :  { %11 = vsyncpa [#allocation6], 0 }
   0x4   :  { %13 = vsyncpa [#allocation6 + $0x1], 0 }
   0x5   :  { %14 = vsyncpa [#allocation9], 0 }
   0x6   :  { %15 = vsyncpa [#allocation12], 0 }
   0x7   :  { %16 = vsyncpa [#allocation7], 0 }
   0x8   :  { %18 = vsyncpa [#allocation7 + $0x1], 0  ;;  %s2580_s21 = smov 0   ;;  %s2582_s22 = smov 0  }
   0x9   :  { %s2584_s23 = smov 0   ;;  %s2586_s24 = smov 0  }
   0xa   :  { %s2588_s25 = smov 0   ;;  %s2590_s26 = smov 0  }
   0xb LB: > { %s1948_s27 = sadd.s32 4294967295, %s2530_s26   ;;  %s1949_s28 = sadd.s32 4294967294, %s2530_s26   ;;  %s2530_s26 = sphi %s2590_s26, %s24_s26   ;;  %s2526_s25 = sphi %s2588_s25, %s3574_s25   ;;  %s2522_s24 = sphi %s2586_s24, %s3573_s24   ;;  %s2518_s23 = sphi %s2584_s23, %s3572_s23   ;;  %s2514_s22 = sphi %s2582_s22, %s3571_s22   ;;  %s2510_s21 = sphi %s2580_s21, %s3570_s21  }
   0xc   : > { %p58_p0 = scmp.ne.s32.totalorder %s2514_s22, %s2510_s21  ;;  %p2614_p1 = scmp.eq.s32.totalorder %s1948_s27, 0 }
   0xd   : > { %p2618_p2 = scmp.eq.s32.totalorder %s1948_s27, 1  ;;  %p195_p3 = scmp.eq.s32.totalorder %s1949_s28, 1 }
   0xe   : > { %s3460_s29 = scalar_select %p2614_p1, 1, 0 }
   0xf   : > { %p2624_p4 = por %p2614_p1, %p58_p0  ;;  %p1950_p5 = scmp.ge.s32.totalorder %s2530_s26, 1 }
  0x10   : > { %p2629_p6 = por %p195_p3, %p58_p0  ;;  %p202_p7 = scmp.lt.s32.totalorder %s2530_s26, 3 }
  0x11   : > { %s3462_s7 = scalar_select %p2624_p4, 1, 0 }
  0x12   : > { %s3463_s8 = scalar_select %p2629_p6, 1, 0 }
  0x13   : > { %p2634_p8 = pnand %p1950_p5, %p202_p7  ;;  %s2532_s10 = smov [#allocation8]  }
  0x14   : > { %s214_s11 = sshll.u32 %s2532_s10, 4  ;;  %s2533_s13 = smov [#allocation10]   ;;  %s215_s11 = int_to_ptr.vmem [resolvable:$true] %s214_s11 }
  0x15   : > { %s3464_s9 = scalar_select %p2634_p8, 1, 0 }
  0x16   : > { %p2091_p9 = pneg %p2634_p8  ;;  %s227_s14 = sshll.u32 %s2533_s13, 4  ;;  %s228_s14 = int_to_ptr.vmem [resolvable:$true] %s227_s14 }
  0x17   : > { %s2534_s15 = smov [#allocation11]   ;;  %s2347_s17 = scalar_lea.vmem %s215_s11, 8192 }
  0x18   : > { %p2643_p11 = pnand %p2091_p9, %p2614_p1  ;;  %s243_s16 = sshll.u32 %s2534_s15, 4  ;;  %s244_s16 = int_to_ptr.vmem [resolvable:$true] %s243_s16 }
  0x19   : > { %p2348_p13 = scmp.ne.s32.totalorder %s215_s11, %s2347_s17  ;;  %p2355_p5 = scmp.lt.s32.totalorder %s215_s11, %s215_s11 }
  0x1a   : > { %p2338_p12 = pneg %p2643_p11  ;;  %p2356_p7 = scmp.lt.s32.totalorder %s2347_s17, %s2347_s17 }
  0x1c   : > { %p2350_p0 = pnand %p2348_p13, %p2338_p12  ;;  %p2357_p9 = por %p2356_p7, %p2355_p5 }
  0x1e   : > { %p2351_p3 = pneg %p2350_p0 }
  0x20   : > { %p2358_p10 = pnand %p2357_p9, %p2351_p3 }
  0x22   : > { %2361 = shalt.err (!%p2358_p10)
}
  0x23   : > { %s2535_s18 = smov 512   ;;  %s2536_s19 = smov 32  }
  0x24   : > { %s3466_s1 = sld [smem:[#allocation64_spill]]  ;;  %s2373_s28 = scalar_lea.vmem %s228_s14, 8192 }
  0x25   : > { %p2374_p6 = scmp.ne.s32.totalorder %s228_s14, %s2373_s28  ;;  %p2381_p1 = scmp.lt.s32.totalorder %s228_s14, %s228_s14 }
  0x26   : > { %p2382_p4 = scmp.lt.s32.totalorder %s2373_s28, %s2373_s28 }
  0x27   : > { %p2376_p13 = pnand %p2374_p6, %p2338_p12 }
  0x28   : > { %p2383_p5 = por %p2382_p4, %p2381_p1 }
  0x29   : > { %p2377_p0 = pneg %p2376_p13 }
  0x2a   : > { %2094 = dma.hbm_to_vmem [thread:$0]  (!%p2643_p11), %s3466_s1, 8192, %s215_s11, [#allocation9], %s2535_s18, %s2535_s18, %s2536_s19  }
  0x2b   : > { %p2384_p3 = pnand %p2383_p5, %p2377_p0 }
  0x2d   : > { %2387 = shalt.err (!%p2384_p3)
}
  0x2e   : > { %s3467_s2 = sld [smem:[#allocation65_spill]]  ;;  %s2399_s11 = scalar_lea.vmem %s244_s16, 2048 }
  0x2f   : > { %p2400_p10 = scmp.ne.s32.totalorder %s244_s16, %s2399_s11  ;;  %p2407_p9 = scmp.lt.s32.totalorder %s244_s16, %s244_s16 }
  0x30   : > { %p2408_p13 = scmp.lt.s32.totalorder %s2399_s11, %s2399_s11 }
  0x31   : > { %p2402_p7 = pnand %p2400_p10, %p2338_p12 }
  0x32   : > { %p2409_p8 = por %p2408_p13, %p2407_p9 }
  0x33   : > { %p2403_p6 = pneg %p2402_p7 }
  0x34   : > { %2097 = dma.hbm_to_vmem [thread:$0]  (!%p2643_p11), %s3467_s2, 8192, %s228_s14, [#allocation9], %s2535_s18, %s2535_s18, %s2536_s19  }
  0x35   : > { %p2410_p1 = pnand %p2409_p8, %p2403_p6 }
  0x37   : > { %2413 = shalt.err (!%p2410_p1)
}
  0x38   : > { %s3410_s15 = smov 128   ;;  %s3411_s14 = smov 8  }
  0x39   : > { %2100 = dma.hbm_to_vmem [thread:$0]  (!%p2643_p11), %s3403_s4, 2048, %s244_s16, [#allocation12], %s3410_s15, %s3410_s15, %s3411_s14  }
  0x3a   : > { %s45_s19 = sadd.s32 1, %s2518_s23  ;;  %s33_s20 = sadd.s32 1, %s2526_s25 }
  0x3b   : > { %p52_p4 = scmp.ne.s32.totalorder %s2518_s23, %s2514_s22  ;;  %p34_p8 = scmp.ge.s32.totalorder %s33_s20, 2 }
  0x3c   : > { %p53_p12 = scmp.eq.s32.totalorder %s2530_s26, 0  ;;  %p2112_p5 = scmp.lt.s32.totalorder %s2530_s26, 2 }
  0x3d   : > { %p2683_p0 = por %p2618_p2, %p52_p4  ;;  %s3576_s20 = smov (%p34_p8, %s33_s20), 0 }
  0x3e   : > { %p54_p3 = por %p53_p12, %p52_p4  ;;  %s260_s12 = sand.u32 1, %s2518_s23  }
  0x3f   : > { %s40_s28 = ssub.s32 %s2526_s25, %s3576_s20  ;;  %s1955_s16 = sshll.u32 %s260_s12, 6 }
  0x40   : > { %p43_p10 = scmp.eq.s32.totalorder %s40_s28, 0  ;;  %s2004_s10 = sshll.u32 %s2526_s25, 10 }
  0x41   : > { %s273_s30 = scalar_lea.hbm %s3399_s0, %s2004_s10  ;;  %s264_s18 = scalar_lea.vmem [#allocation5], %s1955_s16 }
  0x42   : > { %s2695_s13 = scalar_select %p43_p10, %s2518_s23, %s45_s19  }
  0x43   : > { %s274_s15 = sshll.u32 %s264_s18, 4  ;;  %p2702_p2 = pnand %p2112_p5, %p54_p3  ;;  %s275_s15 = int_to_ptr.vmem [resolvable:$true] %s274_s15 }
  0x44   : > { %s261_s1 = scalar_lea.sflag [#allocation6], %s260_s12  ;;  %s2427_s28 = scalar_lea.vmem %s275_s15, 1024 }
  0x45   : > { %p2416_p11 = pneg %p2702_p2  ;;  %p2428_p7 = scmp.ne.s32.totalorder %s275_s15, %s2427_s28 }
  0x46   : > { %s2539_s19 = smov [#allocation5]  }
  0x47   : > { %p2430_p6 = pnand %p2428_p7, %p2416_p11  ;;  %s2432_s2 = sshll.u32 %s2539_s19, 4  ;;  %s2433_s2 = int_to_ptr.vmem [resolvable:$false] %s2432_s2 }
  0x48   : > { %s2434_s10 = scalar_lea.vmem %s2433_s2, 2048  ;;  %p2435_p13 = scmp.lt.s32.totalorder %s275_s15, %s2433_s2 }
  0x49   : > { %p2431_p9 = pneg %p2430_p6  ;;  %p2436_p1 = scmp.lt.s32.totalorder %s2434_s10, %s2427_s28 }
  0x4b   : > { %p2437_p4 = por %p2436_p1, %p2435_p13 }
  0x4d   : > { %p2438_p8 = pnand %p2437_p4, %p2431_p9 }
  0x4f   : > { %2441 = shalt.err (!%p2438_p8)
}
  0x50   : > { %s3470_s16 = smov 8   ;;  %s3471_s11 = smov 128  }
  0x51   : > { %2104 = dma.hbm_to_vmem [thread:$0]  (!%p2702_p2), %s273_s30, 1024, %s275_s15, %s261_s1, %s3471_s11, %s3471_s11, %s3470_s16  }
  0x52   : > { %p3472_p12 = scmp.ne.s32.totalorder %s3464_s9, 0 }
  0x54   : > { %286 = sbr.rel (%p3472_p12) target bundleno = 1404 (0x57c), region = 44 }
  0x59   : > { %s2716_s12 = sand.u32 1, %s2514_s22   ;;  %p3473_p5 = scmp.ne.s32.totalorder %s3462_s7, 0 }
  0x5a   : > { %s1960_s2 = sshll.u32 %s2716_s12, 6  ;;  %s289_s17 = scalar_lea.sflag [#allocation6], %s2716_s12 }
  0x5b   : > { %s2720_s18 = scalar_lea.vmem [#allocation5], %s1960_s2 }
  0x5c   : > { %2493 = dma.done.wait (%p3473_p5), %s289_s17, 1024  }
  0x5d   : > { %2495 = vsyncadd (%p3473_p5), %s289_s17, 4294966272  ;;  %p3474_p3 = scmp.ne.s32.totalorder %s3460_s29, 0 }
  0x5f   : > { %2497 = dma.done.wait (%p3474_p3), [#allocation9], 16384  }
  0x60   : > { %2499 = vsyncadd (%p3474_p3), [#allocation9], 4294950912 }
  0x61   : > { %2501 = dma.done.wait (%p3474_p3), [#allocation12], 2048  }
  0x62   : > { %2503 = vsyncadd (%p3474_p3), [#allocation12], 4294965248  ;;  %s2734_s1 = scalar_lea.vmem [#allocation13], %s1960_s2  ;;  %p1965_p10 = scmp.ne.s32.totalorder %s2522_s24, 0 }
  0x64   : > { %340 = sbr.rel (%p1965_p10) target bundleno = 108 (0x6c), region = 64 }
  0x69   : > { %v2540_v0 = vmov 0.0  }
  0x6a   : > { %341 = vst [vmem:[#allocation3] sm:$0xff] %v2540_v0  ;;  %342 = vst [vmem:[#allocation3 + $0x8] sm:$0xff] %v2540_v0 }
  0x6b   : > { %343 = vst [vmem:[#allocation4 + $0x8] sm:$0xff] %v2540_v0  ;;  %344 = vst [vmem:[#allocation4] sm:$0xff] %v2540_v0 }
  0x6c PF: > { %v414_v1 = vld [vmem:[#allocation8 + $0x1e8] sm:$0xff]  ;;  %v413_v2 = vld [vmem:[#allocation8 + $0x1e0] sm:$0xff]  ;;  %v3412_v7 = vmov 0.0   ;;  %s2006_s14 = sshll.u32 %s2522_s24, 10  ;;  %s1832_s30 = sshll.u32 %s2734_s1, 4  ;;  %s3349_s30 = int_to_ptr.vmem [resolvable:$true] %s1832_s30 }
  0x6d   : > { %v410_v3 = vld [vmem:[#allocation8 + $0x1c8] sm:$0xff]  ;;  %439 = vmatprep.subr.mxu1 %v414_v1  ;;  %v409_v5 = vld [vmem:[#allocation8 + $0x1c0] sm:$0xff]  ;;  %503 = vmatprep.mubr.f32.mxu1 %v3412_v7  ;;  %s3347_s10 = scalar_lea.hbm %s3405_s6, %s2006_s14  ;;  %s1816_s16 = scalar_lea.sflag [#allocation7], %s2716_s12 }
  0x6e   : > { %v2737_v4 = vld [vmem:[#allocation10 + $0x1e8] sm:$0xff]  ;;  %v2739_v6 = vld [vmem:[#allocation10 + $0x1e0] sm:$0xff]  ;;  %440 = vmatpush1.msra.mxu1 %v413_v2  ;;  %v416_v2 = vld [vmem:[#allocation8 + $0x1f8] sm:$0xff]  ;;  %837 = vmatprep.mubr.f32.mxu0 %v3412_v7  ;;  %s2442_s11 = scalar_lea.vmem %s3349_s30, 1024  ;;  %s2542_s24 = smov [#allocation13]  }
  0x6f   : > { %773 = vmatprep.subr.mxu0 %v2737_v4  ;;  %v406_v8 = vld [vmem:[#allocation8 + $0x1a8] sm:$0xff]  ;;  %441 = vmatprep.subr.mxu1 %v410_v3  ;;  %v405_v10 = vld [vmem:[#allocation8 + $0x1a0] sm:$0xff]  ;;  %v415_v3 = vld [vmem:[#allocation8 + $0x1f0] sm:$0xff]  ;;  %p2443_p2 = scmp.ne.s32.totalorder %s3349_s30, %s2442_s11  ;;  %s2446_s2 = sshll.u32 %s2542_s24, 4  ;;  %s2447_s2 = int_to_ptr.vmem [resolvable:$false] %s2446_s2 }
  0x70   : > { %v2743_v9 = vld [vmem:[#allocation10 + $0x1c8] sm:$0xff]  ;;  %774 = vmatpush1.msra.mxu0 %v2739_v6  ;;  %v2746_v11 = vld [vmem:[#allocation10 + $0x1c0] sm:$0xff]  ;;  %442 = vmatpush1.msra.mxu1 %v409_v5  ;;  %s2448_s17 = scalar_lea.vmem %s2447_s2, 2048  ;;  %p2449_p6 = scmp.lt.s32.totalorder %s3349_s30, %s2447_s2 }
  0x71   : > { %v2748_v12 = vld [vmem:[#allocation10 + $0x1a8] sm:$0xff]  ;;  %775 = vmatprep.subr.mxu0 %v2743_v9  ;;  %v2751_v14 = vld [vmem:[#allocation10 + $0x1a0] sm:$0xff]  ;;  %443 = vmatprep.subr.mxu1 %v406_v8  ;;  %v412_v8 = vld [vmem:[#allocation8 + $0x1d8] sm:$0xff]  ;;  %p2444_p11 = pnand %p2443_p2, %p2683_p0  ;;  %p2450_p9 = scmp.lt.s32.totalorder %s2448_s17, %s2442_s11 }
  0x72   : > { %v402_v13 = vld [vmem:[#allocation8 + $0x188] sm:$0xff]  ;;  %776 = vmatpush1.msra.mxu0 %v2746_v11  ;;  %v401_v15 = vld [vmem:[#allocation8 + $0x180] sm:$0xff]  ;;  %444 = vmatpush1.msra.mxu1 %v405_v10 }
  0x73   : > { %v2754_v16 = vld [vmem:[#allocation10 + $0x188] sm:$0xff]  ;;  %777 = vmatprep.subr.mxu0 %v2748_v12  ;;  %v2757_v18 = vld [vmem:[#allocation10 + $0x180] sm:$0xff]  ;;  %445 = vmatprep.subr.mxu1 %v402_v13  ;;  %v411_v13 = vld [vmem:[#allocation8 + $0x1d0] sm:$0xff]  ;;  %p2445_p7 = pneg %p2444_p11  ;;  %p2451_p13 = por %p2450_p9, %p2449_p6 }
  0x74   : > { %v398_v17 = vld [vmem:[#allocation8 + $0x168] sm:$0xff]  ;;  %778 = vmatpush1.msra.mxu0 %v2751_v14  ;;  %v397_v19 = vld [vmem:[#allocation8 + $0x160] sm:$0xff]  ;;  %446 = vmatpush1.msra.mxu1 %v401_v15 }
  0x75   : > { %v2760_v20 = vld [vmem:[#allocation10 + $0x168] sm:$0xff]  ;;  %779 = vmatprep.subr.mxu0 %v2754_v16  ;;  %v2763_v22 = vld [vmem:[#allocation10 + $0x160] sm:$0xff]  ;;  %447 = vmatprep.subr.mxu1 %v398_v17  ;;  %v408_v17 = vld [vmem:[#allocation8 + $0x1b8] sm:$0xff]  ;;  %p2452_p1 = pnand %p2451_p13, %p2445_p7 }
  0x76   : > { %v394_v21 = vld [vmem:[#allocation8 + $0x148] sm:$0xff]  ;;  %780 = vmatpush1.msra.mxu0 %v2757_v18  ;;  %v393_v23 = vld [vmem:[#allocation8 + $0x140] sm:$0xff]  ;;  %448 = vmatpush1.msra.mxu1 %v397_v19  ;;  %v407_v19 = vld [vmem:[#allocation8 + $0x1b0] sm:$0xff] }
  0x77   : > { %v2766_v24 = vld [vmem:[#allocation10 + $0x148] sm:$0xff]  ;;  %781 = vmatprep.subr.mxu0 %v2760_v20  ;;  %v2769_v26 = vld [vmem:[#allocation10 + $0x140] sm:$0xff]  ;;  %449 = vmatprep.subr.mxu1 %v394_v21  ;;  %v404_v21 = vld [vmem:[#allocation8 + $0x198] sm:$0xff] }
  0x78   : > { %v390_v25 = vld [vmem:[#allocation8 + $0x128] sm:$0xff]  ;;  %782 = vmatpush1.msra.mxu0 %v2763_v22  ;;  %v389_v27 = vld [vmem:[#allocation8 + $0x120] sm:$0xff]  ;;  %450 = vmatpush1.msra.mxu1 %v393_v23 }
  0x79   : > { %v2772_v28 = vld [vmem:[#allocation10 + $0x128] sm:$0xff]  ;;  %783 = vmatprep.subr.mxu0 %v2766_v24  ;;  %v2775_v30 = vld [vmem:[#allocation10 + $0x120] sm:$0xff]  ;;  %451 = vmatprep.subr.mxu1 %v390_v25  ;;  %v403_v25 = vld [vmem:[#allocation8 + $0x190] sm:$0xff] }
  0x7a   : > { %v386_v29 = vld [vmem:[#allocation8 + $0x108] sm:$0xff]  ;;  %784 = vmatpush1.msra.mxu0 %v2769_v26  ;;  %v385_v31 = vld [vmem:[#allocation8 + $0x100] sm:$0xff]  ;;  %452 = vmatpush1.msra.mxu1 %v389_v27  ;;  %v2852_v27 = vld [vmem:[%s2720_s18 + $0x10] sm:$0xff] }
  0x7b   : > { %v2778_v32 = vld [vmem:[#allocation10 + $0x108] sm:$0xff]  ;;  %785 = vmatprep.subr.mxu0 %v2772_v28  ;;  %v2781_v34 = vld [vmem:[#allocation10 + $0x100] sm:$0xff]  ;;  %453 = vmatprep.subr.mxu1 %v386_v29  ;;  %v400_v29 = vld [vmem:[#allocation8 + $0x178] sm:$0xff] }
  0x7c   : > { %v382_v33 = vld [vmem:[#allocation8 + $0xe8] sm:$0xff]  ;;  %786 = vmatpush1.msra.mxu0 %v2775_v30  ;;  %v381_v35 = vld [vmem:[#allocation8 + $0xe0] sm:$0xff]  ;;  %454 = vmatpush1.msra.mxu1 %v385_v31  ;;  %v399_v31 = vld [vmem:[#allocation8 + $0x170] sm:$0xff] }
  0x7d   : > { %v2784_v36 = vld [vmem:[#allocation10 + $0xe8] sm:$0xff]  ;;  %787 = vmatprep.subr.mxu0 %v2778_v32  ;;  %v2787_v38 = vld [vmem:[#allocation10 + $0xe0] sm:$0xff]  ;;  %455 = vmatprep.subr.mxu1 %v382_v33  ;;  %v396_v33 = vld [vmem:[#allocation8 + $0x158] sm:$0xff] }
  0x7e   : > { %v378_v37 = vld [vmem:[#allocation8 + $0xc8] sm:$0xff]  ;;  %788 = vmatpush1.msra.mxu0 %v2781_v34  ;;  %v377_v39 = vld [vmem:[#allocation8 + $0xc0] sm:$0xff]  ;;  %456 = vmatpush1.msra.mxu1 %v381_v35  ;;  %v395_v35 = vld [vmem:[#allocation8 + $0x150] sm:$0xff] }
  0x7f   : > { %v2790_v40 = vld [vmem:[#allocation10 + $0xc8] sm:$0xff]  ;;  %789 = vmatprep.subr.mxu0 %v2784_v36  ;;  %v2793_v42 = vld [vmem:[#allocation10 + $0xc0] sm:$0xff]  ;;  %457 = vmatprep.subr.mxu1 %v378_v37  ;;  %v2859_v37 = vld [vmem:[%s2720_s18 + $0x18] sm:$0xff] }
  0x80   : > { %v374_v41 = vld [vmem:[#allocation8 + $0xa8] sm:$0xff]  ;;  %3475 = vst [vmem:[#allocation18_spill] sm:$0xff] %v2793_v42  ;;  %790 = vmatpush1.msra.mxu0 %v2787_v38  ;;  %v373_v43 = vld [vmem:[#allocation8 + $0xa0] sm:$0xff]  ;;  %458 = vmatpush1.msra.mxu1 %v377_v39  ;;  %v392_v39 = vld [vmem:[#allocation8 + $0x138] sm:$0xff] }
  0x81   : > { %v2796_v44 = vld [vmem:[#allocation10 + $0xa8] sm:$0xff]  ;;  %791 = vmatprep.subr.mxu0 %v2790_v40  ;;  %v2799_v46 = vld [vmem:[#allocation10 + $0xa0] sm:$0xff]  ;;  %459 = vmatprep.subr.mxu1 %v374_v41  ;;  %v391_v41 = vld [vmem:[#allocation8 + $0x130] sm:$0xff] }
  0x82   : > { %3476 = vst [vmem:[#allocation19_spill] sm:$0xff] %v2796_v44  ;;  %v370_v45 = vld [vmem:[#allocation8 + $0x88] sm:$0xff]  ;;  %3477 = vst [vmem:[#allocation20_spill] sm:$0xff] %v2799_v46  ;;  %792 = vmatpush1.msra.mxu0 %v2793_v42  ;;  %v369_v47 = vld [vmem:[#allocation8 + $0x80] sm:$0xff]  ;;  %460 = vmatpush1.msra.mxu1 %v373_v43 }
  0x83   : > { %v2802_v48 = vld [vmem:[#allocation10 + $0x88] sm:$0xff]  ;;  %793 = vmatprep.subr.mxu0 %v2796_v44  ;;  %v2805_v50 = vld [vmem:[#allocation10 + $0x80] sm:$0xff]  ;;  %461 = vmatprep.subr.mxu1 %v370_v45  ;;  %v388_v43 = vld [vmem:[#allocation8 + $0x118] sm:$0xff] }
  0x84   : > { %3478 = vst [vmem:[#allocation21_spill] sm:$0xff] %v2802_v48  ;;  %v366_v49 = vld [vmem:[#allocation8 + $0x68] sm:$0xff]  ;;  %3479 = vst [vmem:[#allocation22_spill] sm:$0xff] %v2805_v50  ;;  %794 = vmatpush1.msra.mxu0 %v2799_v46  ;;  %v365_v51 = vld [vmem:[#allocation8 + $0x60] sm:$0xff]  ;;  %462 = vmatpush1.msra.mxu1 %v369_v47 }
  0x85   : > { %v2808_v52 = vld [vmem:[#allocation10 + $0x68] sm:$0xff]  ;;  %795 = vmatprep.subr.mxu0 %v2802_v48  ;;  %v2811_v54 = vld [vmem:[#allocation10 + $0x60] sm:$0xff]  ;;  %463 = vmatprep.subr.mxu1 %v366_v49  ;;  %v387_v45 = vld [vmem:[#allocation8 + $0x110] sm:$0xff] }
  0x86   : > { %3480 = vst [vmem:[#allocation23_spill] sm:$0xff] %v2808_v52  ;;  %v362_v53 = vld [vmem:[#allocation8 + $0x48] sm:$0xff]  ;;  %3481 = vst [vmem:[#allocation24_spill] sm:$0xff] %v2811_v54  ;;  %796 = vmatpush1.msra.mxu0 %v2805_v50  ;;  %v361_v55 = vld [vmem:[#allocation8 + $0x40] sm:$0xff]  ;;  %464 = vmatpush1.msra.mxu1 %v365_v51 }
  0x87   : > { %v2814_v56 = vld [vmem:[#allocation10 + $0x48] sm:$0xff]  ;;  %797 = vmatprep.subr.mxu0 %v2808_v52  ;;  %v2817_v58 = vld [vmem:[#allocation10 + $0x40] sm:$0xff]  ;;  %465 = vmatprep.subr.mxu1 %v362_v53  ;;  %v384_v49 = vld [vmem:[#allocation8 + $0xf8] sm:$0xff] }
  0x88   : > { %3482 = vst [vmem:[#allocation25_spill] sm:$0xff] %v2814_v56  ;;  %v358_v57 = vld [vmem:[#allocation8 + $0x28] sm:$0xff]  ;;  %3483 = vst [vmem:[#allocation26_spill] sm:$0xff] %v2817_v58  ;;  %798 = vmatpush1.msra.mxu0 %v2811_v54  ;;  %v357_v59 = vld [vmem:[#allocation8 + $0x20] sm:$0xff]  ;;  %466 = vmatpush1.msra.mxu1 %v361_v55 }
  0x89   : > { %v2820_v60 = vld [vmem:[#allocation10 + $0x28] sm:$0xff]  ;;  %799 = vmatprep.subr.mxu0 %v2814_v56  ;;  %v2823_v62 = vld [vmem:[#allocation10 + $0x20] sm:$0xff]  ;;  %467 = vmatprep.subr.mxu1 %v358_v57  ;;  %v383_v51 = vld [vmem:[#allocation8 + $0xf0] sm:$0xff] }
  0x8a   : > { %3484 = vst [vmem:[#allocation27_spill] sm:$0xff] %v2820_v60  ;;  %v354_v61 = vld [vmem:[#allocation8 + $0x8] sm:$0xff]  ;;  %3485 = vst [vmem:[#allocation28_spill] sm:$0xff] %v2823_v62  ;;  %800 = vmatpush1.msra.mxu0 %v2817_v58  ;;  %v353_v63 = vld [vmem:[#allocation8] sm:$0xff]  ;;  %468 = vmatpush1.msra.mxu1 %v357_v59 }
  0x8b   : > { %v2826_v0 = vld [vmem:[#allocation10 + $0x8] sm:$0xff]  ;;  %801 = vmatprep.subr.mxu0 %v2820_v60  ;;  %v2830_v1 = vld [vmem:[%s2720_s18] sm:$0xff]  ;;  %469 = vmatprep.subr.mxu1 %v354_v61  ;;  %v376_v55 = vld [vmem:[#allocation8 + $0xb8] sm:$0xff] }
  0x8c   : > { %3486 = vst [vmem:[#allocation29_spill] sm:$0xff] %v2826_v0  ;;  %802 = vmatpush1.msra.mxu0 %v2823_v62  ;;  %v2833_v5 = vld [vmem:[#allocation10] sm:$0xff]  ;;  %470 = vmatpush1.msra.mxu1 %v353_v63  ;;  %v2842_v15 = vld [vmem:[%s2720_s18 + $0x8] sm:$0xff]  ;;  %v375_v57 = vld [vmem:[#allocation8 + $0xb0] sm:$0xff] }
  0x8d   : > { %3487 = vst [vmem:[#allocation30_spill] sm:$0xff] %v2833_v5  ;;  %803 = vmatprep.subr.mxu0 %v2826_v0  ;;  %504 = vmatmul.mubr.f32.vlgmr.msra.gmra.mxu1 %v2830_v1  ;;  %v2837_v10 = vld [vmem:[#allocation3] sm:$0xff]  ;;  %v2847_v23 = vld [vmem:[#allocation3 + $0x8] sm:$0xff]  ;;  %v2880_v59 = vld [vmem:[%s2720_s18 + $0x30] sm:$0xff] }
  0x8e   : > { %552 = vmatprep.subr.mxu1 %v416_v2  ;;  %804 = vmatpush1.msra.mxu0 %v2833_v5  ;;  %v2866_v47 = vld [vmem:[%s2720_s18 + $0x20] sm:$0xff]  ;;  %v2873_v53 = vld [vmem:[%s2720_s18 + $0x28] sm:$0xff]  ;;  %v368_v61 = vld [vmem:[#allocation8 + $0x78] sm:$0xff] }
  0x8f   : > { %553 = vmatpush1.msra.mxu1 %v415_v3  ;;  %838 = vmatmul.mubr.f32.vlgmr.msra.gmra.mxu0 %v2837_v10  ;;  %v367_v63 = vld [vmem:[#allocation8 + $0x70] sm:$0xff]  ;;  %v2887_v3 = vld [vmem:[%s2720_s18 + $0x38] sm:$0xff] }
  0x90   : > { %554 = vmatprep.subr.mxu1 %v412_v8  ;;  %509 = vmatprep.mubr.f32.mxu1 %v3412_v7  ;;  %v363_v2 = vld [vmem:[#allocation8 + $0x50] sm:$0xff]  ;;  %v360_v8 = vld [vmem:[#allocation8 + $0x38] sm:$0xff] }
  0x91   : > { %555 = vmatpush1.msra.mxu1 %v411_v13  ;;  %843 = vmatprep.mubr.f32.mxu0 %v3412_v7  ;;  %v359_v13 = vld [vmem:[#allocation8 + $0x30] sm:$0xff] }
  0x92   : > { %510 = vmatmul.mubr.f32.gmra.mxu1 %v2842_v15  ;;  %556 = vmatprep.subr.mxu1 %v408_v17  ;;  %v356_v17 = vld [vmem:[#allocation8 + $0x18] sm:$0xff] }
  0x93   : > { %557 = vmatpush1.msra.mxu1 %v407_v19  ;;  %515 = vmatprep.mubr.f32.mxu1 %v3412_v7  ;;  %v355_v19 = vld [vmem:[#allocation8 + $0x10] sm:$0xff] }
  0x94   : > { %558 = vmatprep.subr.mxu1 %v404_v21  ;;  %844 = vmatmul.mubr.f32.gmra.mxu0 %v2847_v23  ;;  %v2893_v21 = vld [vmem:[#allocation10 + $0x1f8] sm:$0xff] }
  0x95   : > { %559 = vmatpush1.msra.mxu1 %v403_v25  ;;  %994 = vmatprep.subr.mxu0 %v2737_v4  ;;  %3488 = vst [vmem:[#allocation31_spill] sm:$0xff] %v2893_v21  ;;  %v2895_v25 = vld [vmem:[#allocation10 + $0x1f0] sm:$0xff] }
  0x96   : > { %516 = vmatmul.mubr.f32.gmra.mxu1 %v2852_v27  ;;  %560 = vmatprep.subr.mxu1 %v400_v29  ;;  %v2898_v29 = vld [vmem:[#allocation10 + $0x1d8] sm:$0xff] }
  0x97   : > { %561 = vmatpush1.msra.mxu1 %v399_v31  ;;  %521 = vmatprep.mubr.f32.mxu1 %v3412_v7  ;;  %v2903_v31 = vld [vmem:[#allocation10 + $0x1d0] sm:$0xff] }
  0x98   : > { %562 = vmatprep.subr.mxu1 %v396_v33  ;;  %995 = vmatpush1.msra.mxu0 %v2739_v6  ;;  %v380_v6 = vld [vmem:[#allocation8 + $0xd8] sm:$0xff] }
  0x99   : > { %563 = vmatpush1.msra.mxu1 %v395_v35  ;;  %996 = vmatprep.subr.mxu0 %v2743_v9  ;;  %v379_v9 = vld [vmem:[#allocation8 + $0xd0] sm:$0xff]  ;;  %v2907_v33 = vld [vmem:[#allocation10 + $0x1b8] sm:$0xff] }
  0x9a   : > { %522 = vmatmul.mubr.f32.gmra.mxu1 %v2859_v37  ;;  %564 = vmatprep.subr.mxu1 %v392_v39  ;;  %v2910_v35 = vld [vmem:[#allocation10 + $0x1b0] sm:$0xff]  ;;  %v2914_v39 = vld [vmem:[#allocation10 + $0x198] sm:$0xff] }
  0x9b   : > { %565 = vmatpush1.msra.mxu1 %v391_v41  ;;  %527 = vmatprep.mubr.f32.mxu1 %v3412_v7  ;;  %v2923_v41 = vld [vmem:[#allocation10 + $0x178] sm:$0xff] }
  0x9c   : > { %566 = vmatprep.subr.mxu1 %v388_v43  ;;  %997 = vmatpush1.msra.mxu0 %v2746_v11  ;;  %v372_v11 = vld [vmem:[#allocation8 + $0x98] sm:$0xff]  ;;  %v2926_v43 = vld [vmem:[#allocation10 + $0x170] sm:$0xff] }
  0x9d   : > { %567 = vmatpush1.msra.mxu1 %v387_v45  ;;  %998 = vmatprep.subr.mxu0 %v2748_v12  ;;  %v371_v12 = vld [vmem:[#allocation8 + $0x90] sm:$0xff]  ;;  %v2930_v45 = vld [vmem:[#allocation10 + $0x158] sm:$0xff] }
  0x9e   : > { %528 = vmatmul.mubr.f32.gmra.mxu1 %v2866_v47  ;;  %568 = vmatprep.subr.mxu1 %v384_v49  ;;  %v2939_v49 = vld [vmem:[#allocation10 + $0x138] sm:$0xff] }
  0x9f   : > { %569 = vmatpush1.msra.mxu1 %v383_v51  ;;  %533 = vmatprep.mubr.f32.mxu1 %v3412_v7  ;;  %v2942_v51 = vld [vmem:[#allocation10 + $0x130] sm:$0xff] }
  0xa0   : > { %570 = vmatprep.subr.mxu1 %v380_v6  ;;  %999 = vmatpush1.msra.mxu0 %v2751_v14  ;;  %v364_v14 = vld [vmem:[#allocation8 + $0x58] sm:$0xff] }
  0xa1   : > { %571 = vmatpush1.msra.mxu1 %v379_v9  ;;  %1000 = vmatprep.subr.mxu0 %v2754_v16  ;;  %v2946_v6 = vld [vmem:[#allocation10 + $0x118] sm:$0xff] }
  0xa2   : > { %534 = vmatmul.mubr.f32.gmra.mxu1 %v2873_v53  ;;  %572 = vmatprep.subr.mxu1 %v376_v55  ;;  %v2955_v9 = vld [vmem:[#allocation10 + $0xf8] sm:$0xff]  ;;  %v2958_v55 = vld [vmem:[#allocation10 + $0xf0] sm:$0xff] }
  0xa3   : > { %573 = vmatpush1.msra.mxu1 %v375_v57  ;;  %539 = vmatprep.mubr.f32.mxu1 %v3412_v7  ;;  %v2962_v57 = vld [vmem:[#allocation10 + $0xd8] sm:$0xff] }
  0xa4   : > { %574 = vmatprep.subr.mxu1 %v372_v11  ;;  %1001 = vmatpush1.msra.mxu0 %v2757_v18  ;;  %v2971_v11 = vld [vmem:[#allocation10 + $0xb8] sm:$0xff] }
  0xa5   : > { %575 = vmatpush1.msra.mxu1 %v371_v12  ;;  %1002 = vmatprep.subr.mxu0 %v2760_v20  ;;  %3490 = vst [vmem:[#allocation33_spill] sm:$0xff] %v2971_v11  ;;  %v2974_v12 = vld [vmem:[#allocation10 + $0xb0] sm:$0xff] }
  0xa6   : > { %540 = vmatmul.mubr.f32.gmra.mxu1 %v2880_v59  ;;  %576 = vmatprep.subr.mxu1 %v368_v61  ;;  %3491 = vst [vmem:[#allocation34_spill] sm:$0xff] %v2974_v12  ;;  %v2978_v61 = vld [vmem:[#allocation10 + $0x98] sm:$0xff] }
  0xa7   : > { %577 = vmatpush1.msra.mxu1 %v367_v63  ;;  %545 = vmatprep.mubr.f32.mxu1 %v3412_v7  ;;  %3492 = vst [vmem:[#allocation35_spill] sm:$0xff] %v2978_v61  ;;  %v2987_v63 = vld [vmem:[#allocation10 + $0x78] sm:$0xff] }
  0xa8   : > { %578 = vmatprep.subr.mxu1 %v364_v14  ;;  %1003 = vmatpush1.msra.mxu0 %v2763_v22  ;;  %3494 = vst [vmem:[#allocation37_spill] sm:$0xff] %v2987_v63  ;;  %v2990_v14 = vld [vmem:[#allocation10 + $0x70] sm:$0xff] }
  0xa9   : > { %579 = vmatpush1.msra.mxu1 %v363_v2  ;;  %1004 = vmatprep.subr.mxu0 %v2766_v24  ;;  %3495 = vst [vmem:[#allocation38_spill] sm:$0xff] %v2990_v14  ;;  %v2994_v2 = vld [vmem:[#allocation10 + $0x58] sm:$0xff] }
  0xaa   : > { %546 = vmatmul.mubr.f32.gmra.mxu1 %v2887_v3  ;;  %580 = vmatprep.subr.mxu1 %v360_v8  ;;  %3496 = vst [vmem:[#allocation39_spill] sm:$0xff] %v2994_v2  ;;  %v3003_v8 = vld [vmem:[#allocation10 + $0x38] sm:$0xff] }
  0xab   : > { %581 = vmatpush1.msra.mxu1 %v359_v13  ;;  %616 = vmatprep.mubr.f32.mxu1 %v3412_v7  ;;  %3498 = vst [vmem:[#allocation41_spill] sm:$0xff] %v3003_v8  ;;  %v3006_v13 = vld [vmem:[#allocation10 + $0x30] sm:$0xff] }
  0xac   : > { %582 = vmatprep.subr.mxu1 %v356_v17  ;;  %1005 = vmatpush1.msra.mxu0 %v2769_v26  ;;  %3499 = vst [vmem:[#allocation42_spill] sm:$0xff] %v3006_v13  ;;  %v3010_v17 = vld [vmem:[#allocation10 + $0x18] sm:$0xff] }
  0xad   : > { %583 = vmatpush1.msra.mxu1 %v355_v19  ;;  %1006 = vmatprep.subr.mxu0 %v2772_v28  ;;  %3500 = vst [vmem:[#allocation43_spill] sm:$0xff] %v3010_v17 }
  0xae   : > { %617 = vmatmul.mubr.f32.vlgmr.msra.gmra.mxu1 %v2830_v1  ;;  %850 = vmatprep.subr.mxu1 %v2893_v21  ;;  %v2919_v1 = vld [vmem:[#allocation10 + $0x190] sm:$0xff] }
  0xaf   : > { %851 = vmatpush1.msra.mxu1 %v2895_v25  ;;  %622 = vmatprep.mubr.f32.mxu1 %v3412_v7 }
  0xb0   : > { %852 = vmatprep.subr.mxu1 %v2898_v29  ;;  %1007 = vmatpush1.msra.mxu0 %v2775_v30 }
  0xb1   : > { %853 = vmatpush1.msra.mxu1 %v2903_v31  ;;  %1008 = vmatprep.subr.mxu0 %v2778_v32 }
  0xb2   : > { %623 = vmatmul.mubr.f32.gmra.mxu1 %v2842_v15  ;;  %854 = vmatprep.subr.mxu1 %v2907_v33  ;;  %v2935_v15 = vld [vmem:[#allocation10 + $0x150] sm:$0xff] }
  0xb3   : > { %855 = vmatpush1.msra.mxu1 %v2910_v35  ;;  %628 = vmatprep.mubr.f32.mxu1 %v3412_v7 }
  0xb4   : > { %856 = vmatprep.subr.mxu1 %v2914_v39  ;;  %1009 = vmatpush1.msra.mxu0 %v2781_v34 }
  0xb5   : > { %857 = vmatpush1.msra.mxu1 %v2919_v1  ;;  %1010 = vmatprep.subr.mxu0 %v2784_v36 }
  0xb6   : > { %629 = vmatmul.mubr.f32.gmra.mxu1 %v2852_v27  ;;  %858 = vmatprep.subr.mxu1 %v2923_v41  ;;  %v2951_v27 = vld [vmem:[#allocation10 + $0x110] sm:$0xff] }
  0xb7   : > { %859 = vmatpush1.msra.mxu1 %v2926_v43  ;;  %634 = vmatprep.mubr.f32.mxu1 %v3412_v7 }
  0xb8   : > { %860 = vmatprep.subr.mxu1 %v2930_v45  ;;  %1011 = vmatpush1.msra.mxu0 %v2787_v38 }
  0xb9   : > { %861 = vmatpush1.msra.mxu1 %v2935_v15  ;;  %1012 = vmatprep.subr.mxu0 %v2790_v40 }
  0xba   : > { %635 = vmatmul.mubr.f32.gmra.mxu1 %v2859_v37  ;;  %862 = vmatprep.subr.mxu1 %v2939_v49  ;;  %v2967_v37 = vld [vmem:[#allocation10 + $0xd0] sm:$0xff] }
  0xbb   : > { %863 = vmatpush1.msra.mxu1 %v2942_v51  ;;  %640 = vmatprep.mubr.f32.mxu1 %v3412_v7  ;;  %3489 = vst [vmem:[#allocation32_spill] sm:$0xff] %v2967_v37 }
  0xbc   : > { %864 = vmatprep.subr.mxu1 %v2946_v6  ;;  %1013 = vmatpush1.msra.mxu0 %v2793_v42 }
  0xbd   : > { %865 = vmatpush1.msra.mxu1 %v2951_v27  ;;  %1014 = vmatprep.subr.mxu0 %v2796_v44 }
  0xbe   : > { %641 = vmatmul.mubr.f32.gmra.mxu1 %v2866_v47  ;;  %866 = vmatprep.subr.mxu1 %v2955_v9  ;;  %v2983_v47 = vld [vmem:[#allocation10 + $0x90] sm:$0xff] }
  0xbf   : > { %867 = vmatpush1.msra.mxu1 %v2958_v55  ;;  %646 = vmatprep.mubr.f32.mxu1 %v3412_v7  ;;  %3493 = vst [vmem:[#allocation36_spill] sm:$0xff] %v2983_v47 }
  0xc0   : > { %868 = vmatprep.subr.mxu1 %v2962_v57  ;;  %1015 = vmatpush1.msra.mxu0 %v2799_v46 }
  0xc1   : > { %869 = vmatpush1.msra.mxu1 %v2967_v37  ;;  %1016 = vmatprep.subr.mxu0 %v2802_v48 }
  0xc2   : > { %647 = vmatmul.mubr.f32.gmra.mxu1 %v2873_v53  ;;  %870 = vmatprep.subr.mxu1 %v2971_v11  ;;  %v2999_v53 = vld [vmem:[#allocation10 + $0x50] sm:$0xff] }
  0xc3   : > { %871 = vmatpush1.msra.mxu1 %v2974_v12  ;;  %652 = vmatprep.mubr.f32.mxu1 %v3412_v7  ;;  %3497 = vst [vmem:[#allocation40_spill] sm:$0xff] %v2999_v53 }
  0xc4   : > { %872 = vmatprep.subr.mxu1 %v2978_v61  ;;  %1017 = vmatpush1.msra.mxu0 %v2805_v50 }
  0xc5   : > { %873 = vmatpush1.msra.mxu1 %v2983_v47  ;;  %1018 = vmatprep.subr.mxu0 %v2808_v52 }
  0xc6   : > { %653 = vmatmul.mubr.f32.gmra.mxu1 %v2880_v59  ;;  %874 = vmatprep.subr.mxu1 %v2987_v63  ;;  %v3015_v59 = vld [vmem:[#allocation10 + $0x10] sm:$0xff] }
  0xc7   : > { %875 = vmatpush1.msra.mxu1 %v2990_v14  ;;  %658 = vmatprep.mubr.f32.mxu1 %v3412_v7  ;;  %3501 = vst [vmem:[#allocation44_spill] sm:$0xff] %v3015_v59 }
  0xc8   : > { %876 = vmatprep.subr.mxu1 %v2994_v2  ;;  %1019 = vmatpush1.msra.mxu0 %v2811_v54 }
  0xc9   : > { %877 = vmatpush1.msra.mxu1 %v2999_v53  ;;  %1020 = vmatprep.subr.mxu0 %v2814_v56 }
  0xca   : > { %659 = vmatmul.mubr.f32.gmra.mxu1 %v2887_v3  ;;  %878 = vmatprep.subr.mxu1 %v3003_v8 }
  0xcb   : > { %879 = vmatpush1.msra.mxu1 %v3006_v13  ;;  %914 = vmatprep.mubr.f32.mxu1 %v3412_v7 }
  0xcc   : > { %880 = vmatprep.subr.mxu1 %v3010_v17  ;;  %1021 = vmatpush1.msra.mxu0 %v2817_v58 }
  0xcd   : > { %881 = vmatpush1.msra.mxu1 %v3015_v59  ;;  %1022 = vmatprep.subr.mxu0 %v2820_v60 }
  0xce   : > { %915 = vmatmul.mubr.f32.vlgmr.msra.gmra.mxu1 %v2837_v10  ;;  %1071 = vmatprep.subr.mxu1 %v2893_v21 }
  0xcf   : > { %920 = vmatprep.mubr.f32.mxu1 %v3412_v7  ;;  %1072 = vmatpush1.msra.mxu1 %v2895_v25 }
  0xd0   : > { %1073 = vmatprep.subr.mxu1 %v2898_v29  ;;  %1023 = vmatpush1.msra.mxu0 %v2823_v62 }
  0xd1   : > { %1074 = vmatpush1.msra.mxu1 %v2903_v31  ;;  %1024 = vmatprep.subr.mxu0 %v2826_v0 }
  0xd2   : > { %921 = vmatmul.mubr.f32.gmra.mxu1 %v2847_v23  ;;  %1075 = vmatprep.subr.mxu1 %v2907_v33 }
  0xd3   : > { %1076 = vmatpush1.msra.mxu1 %v2910_v35  ;;  %1025 = vmatpush1.msra.mxu0 %v2833_v5 }
  0xd4   : > { %1077 = vmatprep.subr.mxu1 %v2914_v39  ;;  %1058 = vmatprep.mubr.f32.mxu0 %v3412_v7 }
  0xd5   : > { %1078 = vmatpush1.msra.mxu1 %v2919_v1  ;;  %1135 = vmatprep.mubr.f32.mxu1 %v3412_v7  ;;  %v417_v7 = vld [vmem:[%s3402_s3] sm:$0xf] }
  0xd6   : > { %1079 = vmatprep.subr.mxu1 %v2923_v41  ;;  %1216 = vmatprep.subr.mxu0 %v2737_v4  ;;  %v419_v4 = vlaneseq }
  0xd7   : > { %1080 = vmatpush1.msra.mxu1 %v2926_v43 }
  0xd8   : > { %1081 = vmatprep.subr.mxu1 %v2930_v45  ;;  %v420_v10 = vshrl.u32 %v419_v4, 7 }
  0xd9   : > { %1082 = vmatpush1.msra.mxu1 %v2935_v15 }
  0xda   : > { %1083 = vmatprep.subr.mxu1 %v2939_v49  ;;  %v421_v19 = vsub.s32 0, %v420_v10  ;;  %v425_v0 = vsub.s32 1, %v420_v10 }
  0xdb   : > { %1084 = vmatpush1.msra.mxu1 %v2942_v51 }
  0xdc   : > { %1085 = vmatprep.subr.mxu1 %v2946_v6  ;;  %v426_v60 = vrot.slane %v417_v7, %v425_v0 }
  0xdd   : > { %1086 = vmatpush1.msra.mxu1 %v2951_v27 }
  0xde   : > { %1087 = vmatprep.subr.mxu1 %v2955_v9 }
  0xdf   : > { %1088 = vmatpush1.msra.mxu1 %v2958_v55 }
  0xe0   : > { %1089 = vmatprep.subr.mxu1 %v2962_v57 }
  0xe1   : > { %1090 = vmatpush1.msra.mxu1 %v2967_v37 }
  0xe2   : > { %1091 = vmatprep.subr.mxu1 %v2971_v11 }
  0xe3   : > { %1092 = vmatpush1.msra.mxu1 %v2974_v12 }
  0xe4   : > { %1093 = vmatprep.subr.mxu1 %v2978_v61 }
  0xe5   : > { %1094 = vmatpush1.msra.mxu1 %v2983_v47  ;;  %v429_v47 = vsub.s32 2, %v420_v10 }
  0xe6   : > { %1095 = vmatprep.subr.mxu1 %v2987_v63 }
  0xe7   : > { %1096 = vmatpush1.msra.mxu1 %v2990_v14 }
  0xe8   : > { %1097 = vmatprep.subr.mxu1 %v2994_v2 }
  0xe9   : > { %1098 = vmatpush1.msra.mxu1 %v2999_v53 }
  0xea   : > { %1099 = vmatprep.subr.mxu1 %v3003_v8  ;;  %v422_v8 = vrot.slane %v417_v7, %v421_v19 }
  0xeb   : > { %1100 = vmatpush1.msra.mxu1 %v3006_v13 }
  0xec   : > { %1101 = vmatprep.subr.mxu1 %v3010_v17 }
  0xed   : > { %1102 = vmatpush1.msra.mxu1 %v3015_v59 }
  0xee   : > { %1293 = vmatprep.subr.mxu1 %v2893_v21 }
 0x14d   : > { %v505_v23 = vpop.f32.mrf.mxu1 }
 0x14f   : > { %v507_v3 = vpop.f32.mrf.mxu1 }
 0x152   : > { %v511_v5 = vpop.f32.mrf.mxu1 }
 0x154   : > { %v513_v62 = vpop.f32.mrf.mxu1 }
 0x155   : > { %v514_v12 = vadd.f32 %v513_v62, %v426_v60 }
 0x156   : > { %v517_v13 = vpop.f32.mrf.mxu1 }
 0x157   : > { %v3068_v17 = vadd.f32 %v517_v13, %v422_v8 }
 0x158   : > { %v519_v59 = vpop.f32.mrf.mxu1 }
 0x159   : > { %3502 = vst [vmem:[#allocation45_spill] sm:$0xff] %v3068_v17  ;;  %v3070_v53 = vadd.f32 %v519_v59, %v426_v60 }
 0x15a   : > { %v523_v21 = vpop.f32.mrf.mxu1 }
 0x15b   : > { %3503 = vst [vmem:[#allocation46_spill] sm:$0xff] %v3070_v53  ;;  %v3072_v4 = vadd.f32 %v523_v21, %v422_v8 }
 0x15c   : > { %v525_v58 = vpop.f32.mrf.mxu1 }
 0x15d   : > { %3504 = vst [vmem:[#allocation47_spill] sm:$0xff] %v3072_v4  ;;  %v3074_v2 = vadd.f32 %v525_v58, %v426_v60 }
 0x15e   : > { %v529_v56 = vpop.f32.mrf.mxu1 }
 0x15f   : > { %3505 = vst [vmem:[#allocation48_spill] sm:$0xff] %v3074_v2  ;;  %v3076_v14 = vadd.f32 %v529_v56, %v422_v8  ;;  %v839_v2 = vpop.f32.mrf.mxu0 }
 0x160   : > { %v531_v54 = vpop.f32.mrf.mxu1 }
 0x161   : > { %3506 = vst [vmem:[#allocation49_spill] sm:$0xff] %v3076_v14  ;;  %v3078_v63 = vadd.f32 %v531_v54, %v426_v60 }
 0x162   : > { %v535_v19 = vpop.f32.mrf.mxu1 }
 0x163   : > { %3507 = vst [vmem:[#allocation50_spill] sm:$0xff] %v3078_v63  ;;  %v3080_v52 = vadd.f32 %v535_v19, %v422_v8  ;;  %v841_v63 = vpop.f32.mrf.mxu0  ;;  %v506_v19 = vadd.f32 %v505_v23, %v422_v8 }
 0x164   : > { %v537_v0 = vpop.f32.mrf.mxu1 }
 0x165   : > { %3508 = vst [vmem:[#allocation51_spill] sm:$0xff] %v3080_v52  ;;  %v3082_v13 = vadd.f32 %v537_v0, %v426_v60  ;;  %v508_v0 = vadd.f32 %v507_v3, %v426_v60  ;;  %v845_v50 = vpop.f32.mrf.mxu0 }
 0x166   : > { %v541_v59 = vpop.f32.mrf.mxu1 }
 0x167   : > { %3509 = vst [vmem:[#allocation52_spill] sm:$0xff] %v3082_v13  ;;  %v3084_v53 = vadd.f32 %v541_v59, %v422_v8  ;;  %v433_v59 = vsub.s32 3, %v420_v10  ;;  %v928_v48 = vadd.f32 %v841_v63, %v508_v0 }
 0x168   : > { %v543_v21 = vpop.f32.mrf.mxu1 }
 0x169   : > { %3510 = vst [vmem:[#allocation53_spill] sm:$0xff] %v3084_v53  ;;  %v3086_v4 = vadd.f32 %v543_v21, %v426_v60  ;;  %v927_v53 = vadd.f32 %v839_v2, %v506_v19  ;;  %v512_v21 = vadd.f32 %v511_v5, %v422_v8  ;;  %v434_v46 = vrot.slane %v417_v7, %v433_v59 }
 0x16a   : > { %v547_v58 = vpop.f32.mrf.mxu1  ;;  %v1967_v3 = vmul.f32 -1.442695, %v928_v48 }
 0x16b   : > { %3511 = vst [vmem:[#allocation54_spill] sm:$0xff] %v3086_v4  ;;  %v3088_v17 = vadd.f32 %v547_v58, %v422_v8  ;;  %v430_v4 = vrot.slane %v417_v7, %v429_v47  ;;  %v931_v23 = vadd.f32 %v845_v50, %v512_v21 }
 0x16c   : > { %v549_v56 = vpop.f32.mrf.mxu1 }
 0x16d   : > { %3512 = vst [vmem:[#allocation55_spill] sm:$0xff] %v3088_v17  ;;  %v3090_v14 = vadd.f32 %v549_v56, %v426_v60  ;;  %v847_v17 = vpop.f32.mrf.mxu0  ;;  %v1969_v47 = vmul.f32 -1.442695, %v931_v23 }
 0x16e   : > { %v618_v54 = vpop.f32.mrf.mxu1  ;;  %v932_v37 = vadd.f32 %v847_v17, %v514_v12 }
 0x16f   : > { %3513 = vst [vmem:[#allocation56_spill] sm:$0xff] %v3090_v14  ;;  %v1966_v14 = vmul.f32 -1.442695, %v927_v53  ;;  %v619_v23 = vadd.f32 %v618_v54, %v430_v4 }
 0x170   : > { %v620_v52 = vpop.f32.mrf.mxu1  ;;  %v1970_v60 = vmul.f32 -1.442695, %v932_v37 }
 0x171   : > { %2176 = vpow2.f32 %v1966_v14 }
 0x172   : > { %v624_v13 = vpop.f32.mrf.mxu1  ;;  %2178 = vpow2.f32 %v1967_v3 }
 0x173   : > { %2180 = vpow2.f32 %v1969_v47 }
 0x174   : > { %v626_v61 = vpop.f32.mrf.mxu1  ;;  %2182 = vpow2.f32 %v1970_v60 }
 0x176   : > { %v630_v58 = vpop.f32.mrf.mxu1 }
 0x177   : > { %v3092_v56 = vadd.f32 %v630_v58, %v430_v4 }
 0x178   : > { %v632_v11 = vpop.f32.mrf.mxu1 }
 0x179   : > { %v3094_v44 = vadd.f32 %v632_v11, %v434_v46 }
 0x17a   : > { %v636_v42 = vpop.f32.mrf.mxu1 }
 0x17b   : > { %v3096_v10 = vadd.f32 %v636_v42, %v430_v4 }
 0x17c   : > { %v638_v5 = vpop.f32.mrf.mxu1 }
 0x17d   : > { %v3098_v63 = vadd.f32 %v638_v5, %v434_v46 }
 0x17e   : > { %v642_v7 = vpop.f32.mrf.mxu1  ;;  %v2177_v17 = vpop.eup %2176 }
 0x17f   : > { %v3100_v62 = vadd.f32 %v642_v7, %v430_v4  ;;  %v2179_v0 = vpop.eup %2178  ;;  %v953_v21 = vadd.f32 1.0, %v2177_v17  ;;  %v627_v17 = vadd.f32 %v626_v61, %v434_v46  ;;  %v764_v61 = vld [vmem:[#allocation4] sm:$0xff] }
 0x180   : > { %v644_v2 = vpop.f32.mrf.mxu1  ;;  %v2181_v5 = vpop.eup %2180  ;;  %v954_v47 = vadd.f32 1.0, %v2179_v0 }
 0x181   : > { %v3102_v50 = vadd.f32 %v644_v2, %v434_v46  ;;  %v2183_v7 = vpop.eup %2182  ;;  %v621_v2 = vadd.f32 %v620_v52, %v434_v46  ;;  %2184 = vrcp.f32 %v953_v21 }
 0x182   : > { %v648_v48 = vpop.f32.mrf.mxu1  ;;  %2186 = vrcp.f32 %v954_v47 }
 0x183   : > { %v3104_v11 = vadd.f32 %v648_v48, %v430_v4 }
 0x184   : > { %v650_v42 = vpop.f32.mrf.mxu1 }
 0x185   : > { %v3106_v12 = vadd.f32 %v650_v42, %v434_v46 }
 0x186   : > { %v654_v14 = vpop.f32.mrf.mxu1 }
 0x187   : > { %3514 = vst [vmem:[#allocation57_spill] sm:$0xff] %v3106_v12  ;;  %v3108_v53 = vadd.f32 %v654_v14, %v430_v4  ;;  %v956_v14 = vadd.f32 1.0, %v2181_v5 }
 0x188   : > { %v656_v8 = vpop.f32.mrf.mxu1 }
 0x189   : > { %3515 = vst [vmem:[#allocation58_spill] sm:$0xff] %v3108_v53  ;;  %v3110_v37 = vadd.f32 %v656_v8, %v434_v46  ;;  %v625_v8 = vadd.f32 %v624_v13, %v430_v4 }
 0x18a   : > { %v660_v19 = vpop.f32.mrf.mxu1 }
 0x18b   : > { %3516 = vst [vmem:[#allocation59_spill] sm:$0xff] %v3110_v37  ;;  %v3112_v59 = vadd.f32 %v660_v19, %v430_v4  ;;  %v957_v19 = vadd.f32 1.0, %v2183_v7 }
 0x18c   : > { %v662_v58 = vpop.f32.mrf.mxu1 }
 0x18d   : > { %3517 = vst [vmem:[#allocation60_spill] sm:$0xff] %v3112_v59  ;;  %v3114_v3 = vadd.f32 %v662_v58, %v434_v46 }
 0x18e   : > { %v916_v60 = vpop.f32.mrf.mxu1  ;;  %v2185_v52 = vpop.eup %2184 }
 0x18f   : > { %3518 = vst [vmem:[#allocation61_spill] sm:$0xff] %v3114_v3  ;;  %v929_v48 = vadd.f32 %v916_v60, %v619_v23  ;;  %v2187_v21 = vpop.eup %2186  ;;  %v763_v23 = vld [vmem:[#allocation4 + $0x8] sm:$0xff] }
 0x190   : > { %v918_v42 = vpop.f32.mrf.mxu1  ;;  %v973_v60 = vmul.f32 %v2187_v21, %v763_v23  ;;  %v3134_v21 = vld [vmem:[#allocation10 + $0x1c8] sm:$0xff]  ;;  %v3140_v23 = vld [vmem:[#allocation10 + $0x1c0] sm:$0xff] }
 0x191   : > { %v1968_v37 = vmul.f32 -1.442695, %v929_v48  ;;  %v930_v53 = vadd.f32 %v918_v42, %v621_v2 }
 0x192   : > { %v922_v59 = vpop.f32.mrf.mxu1 }
 0x193   : > { %2188 = vpow2.f32 %v1968_v37  ;;  %v933_v54 = vadd.f32 %v922_v59, %v625_v8 }
 0x194   : > { %2190 = vtanh.f32 %v930_v53  ;;  %v924_v58 = vpop.f32.mrf.mxu1 }
 0x195   : > { %2192 = vrcp.f32 %v956_v14  ;;  %v1971_v0 = vmul.f32 -1.442695, %v933_v54  ;;  %v934_v3 = vadd.f32 %v924_v58, %v627_v17  ;;  %v3520_v58 = vmov 0.0  }
 0x196   : > { %2194 = vrcp.f32 %v957_v19 }
 0x197   : > { %2196 = vpow2.f32 %v1971_v0 }
 0x198   : > { %2198 = vtanh.f32 %v934_v3 }
 0x1a0   : > { %v2189_v4 = vpop.eup %2188 }
 0x1a1   : > { %v2191_v13 = vpop.eup %2190  ;;  %v955_v5 = vadd.f32 1.0, %v2189_v4  ;;  %v3144_v4 = vld [vmem:[#allocation10 + $0x1a8] sm:$0xff] }
 0x1a2   : > { %v2193_v47 = vpop.eup %2192  ;;  %v975_v7 = vmul.f32 %v2191_v13, %v2185_v52  ;;  %v3130_v52 = vld [vmem:[#allocation10 + $0x1e0] sm:$0xff] }
 0x1a3   : > { %v2195_v46 = vpop.eup %2194  ;;  %2200 = vrcp.f32 %v955_v5  ;;  %v3148_v13 = vld [vmem:[#allocation10 + $0x1a0] sm:$0xff] }
 0x1a4   : > { %v2197_v37 = vpop.eup %2196  ;;  %v3116_v53 = vadd.f32 %v975_v7, %v973_v60  ;;  %v974_v3 = vmul.f32 %v2195_v46, %v764_v61  ;;  %v3535_v5 = vld [vmem:[#allocation38_spill] sm:$0xff]  ;;  %v3537_v60 = vld [vmem:[#allocation39_spill] sm:$0xff]  ;;  %v3539_v46 = vld [vmem:[#allocation40_spill] sm:$0xff] }
 0x1a5   : > { %v2199_v59 = vpop.eup %2198  ;;  %v958_v2 = vadd.f32 1.0, %v2197_v37  ;;  %v3538_v7 = vld [vmem:[#allocation26_spill] sm:$0xff]  ;;  %v3540_v61 = vld [vmem:[#allocation27_spill] sm:$0xff]  ;;  %v3541_v37 = vld [vmem:[#allocation41_spill] sm:$0xff] }
 0x1a6   : > { %2202 = vtanh.f32 %v3116_v53  ;;  %v976_v48 = vmul.f32 %v2199_v59, %v2193_v47  ;;  %v3536_v47 = vld [vmem:[#allocation25_spill] sm:$0xff]  ;;  %v3542_v59 = vld [vmem:[#allocation28_spill] sm:$0xff] }
 0x1a7   : > { %2204 = vrcp.f32 %v958_v2  ;;  %v3543_v2 = vld [vmem:[#allocation42_spill] sm:$0xff] }
 0x1a8   : > { %v3119_v42 = vadd.f32 %v976_v48, %v974_v3  ;;  %v3544_v3 = vld [vmem:[#allocation29_spill] sm:$0xff]  ;;  %v3545_v48 = vld [vmem:[#allocation43_spill] sm:$0xff] }
 0x1aa   : > { %2206 = vtanh.f32 %v3119_v42 }
 0x1b0   : > { %v2201_v14 = vpop.eup %2200 }
 0x1b3   : > { %v2203_v8 = vpop.eup %2202 }
 0x1b4   : > { %v3122_v19 = vmul.f32 %v2203_v8, %v2201_v14  ;;  %v2205_v17 = vpop.eup %2204  ;;  %v3546_v14 = vld [vmem:[#allocation30_spill] sm:$0xff]  ;;  %v3547_v8 = vld [vmem:[#allocation44_spill] sm:$0xff] }
 0x1b6   : > { %3519 = vst [vmem:[#allocation62_spill] sm:$0xff] %v3122_v19  ;;  %1059 = vmatmul.mubr.f32.vlgmr.msra.gmra.mxu0 %v3122_v19  ;;  %1136 = vmatmul.mubr.f32.vlgmr.msra.gmra.mxu1 %v3122_v19 }
 0x1b7   : > { %v2207_v54 = vpop.eup %2206  ;;  %1064 = vmatprep.mubr.f32.mxu0 %v3520_v58  ;;  %1141 = vmatprep.mubr.f32.mxu1 %v3520_v58 }
 0x1b8   : > { %v3128_v0 = vmul.f32 %v2207_v54, %v2205_v17  ;;  %1217 = vmatpush1.msra.mxu0 %v3130_v52  ;;  %1294 = vmatpush1.msra.mxu1 %v2895_v25  ;;  %v2309_v17 = vld [vmem:[#allocation10 + $0x1e8] sm:$0xff] }
 0x1b9   : > { %1218 = vmatprep.subr.mxu0 %v3134_v21  ;;  %1295 = vmatprep.subr.mxu1 %v2898_v29  ;;  %v3548_v54 = vld [vmem:[#allocation31_spill] sm:$0xff] }
 0x1ba   : > { %3521 = vst [vmem:[#allocation63_spill] sm:$0xff] %v3128_v0  ;;  %1065 = vmatmul.mubr.f32.gmra.mxu0 %v3128_v0  ;;  %1142 = vmatmul.mubr.f32.gmra.mxu1 %v3128_v0 }
 0x1bb   : > { %1219 = vmatpush1.msra.mxu0 %v3140_v23  ;;  %1296 = vmatpush1.msra.mxu1 %v2903_v31 }
 0x1bc   : > { %1220 = vmatprep.subr.mxu0 %v3144_v4  ;;  %1297 = vmatprep.subr.mxu1 %v2907_v33 }
 0x1bd   : > { %1221 = vmatpush1.msra.mxu0 %v3148_v13  ;;  %1298 = vmatpush1.msra.mxu1 %v2910_v35 }
 0x1be   : > { %1222 = vmatprep.subr.mxu0 %v2754_v16  ;;  %1299 = vmatprep.subr.mxu1 %v2914_v39  ;;  %v3522_v16 = vld [vmem:[#allocation18_spill] sm:$0xff] }
 0x1bf   : > { %1223 = vmatpush1.msra.mxu0 %v2757_v18  ;;  %1300 = vmatpush1.msra.mxu1 %v2919_v1  ;;  %v3523_v18 = vld [vmem:[#allocation32_spill] sm:$0xff] }
 0x1c0   : > { %1224 = vmatprep.subr.mxu0 %v2760_v20  ;;  %1301 = vmatprep.subr.mxu1 %v2923_v41  ;;  %v3524_v20 = vld [vmem:[#allocation19_spill] sm:$0xff] }
 0x1c1   : > { %1225 = vmatpush1.msra.mxu0 %v2763_v22  ;;  %1302 = vmatpush1.msra.mxu1 %v2926_v43  ;;  %v3525_v22 = vld [vmem:[#allocation33_spill] sm:$0xff] }
 0x1c2   : > { %1226 = vmatprep.subr.mxu0 %v2766_v24  ;;  %1303 = vmatprep.subr.mxu1 %v2930_v45  ;;  %v3526_v24 = vld [vmem:[#allocation20_spill] sm:$0xff] }
 0x1c3   : > { %1227 = vmatpush1.msra.mxu0 %v2769_v26  ;;  %1304 = vmatpush1.msra.mxu1 %v2935_v15  ;;  %v3527_v26 = vld [vmem:[#allocation34_spill] sm:$0xff] }
 0x1c4   : > { %1228 = vmatprep.subr.mxu0 %v2772_v28  ;;  %1305 = vmatprep.subr.mxu1 %v2939_v49  ;;  %v3528_v28 = vld [vmem:[#allocation21_spill] sm:$0xff] }
 0x1c5   : > { %1229 = vmatpush1.msra.mxu0 %v2775_v30  ;;  %1306 = vmatpush1.msra.mxu1 %v2942_v51  ;;  %v3529_v30 = vld [vmem:[#allocation35_spill] sm:$0xff] }
 0x1c6   : > { %1230 = vmatprep.subr.mxu0 %v2778_v32  ;;  %1307 = vmatprep.subr.mxu1 %v2946_v6  ;;  %v3530_v32 = vld [vmem:[#allocation22_spill] sm:$0xff] }
 0x1c7   : > { %1231 = vmatpush1.msra.mxu0 %v2781_v34  ;;  %1308 = vmatpush1.msra.mxu1 %v2951_v27  ;;  %v3531_v34 = vld [vmem:[#allocation36_spill] sm:$0xff] }
 0x1c8   : > { %1232 = vmatprep.subr.mxu0 %v2784_v36  ;;  %1309 = vmatprep.subr.mxu1 %v2955_v9  ;;  %v3532_v36 = vld [vmem:[#allocation23_spill] sm:$0xff] }
 0x1c9   : > { %1233 = vmatpush1.msra.mxu0 %v2787_v38  ;;  %1310 = vmatpush1.msra.mxu1 %v2958_v55  ;;  %v3533_v38 = vld [vmem:[#allocation37_spill] sm:$0xff] }
 0x1ca   : > { %1234 = vmatprep.subr.mxu0 %v2790_v40  ;;  %1311 = vmatprep.subr.mxu1 %v2962_v57  ;;  %v3534_v40 = vld [vmem:[#allocation24_spill] sm:$0xff] }
 0x1cb   : > { %1235 = vmatpush1.msra.mxu0 %v3522_v16  ;;  %1312 = vmatpush1.msra.mxu1 %v3523_v18 }
 0x1cc   : > { %1236 = vmatprep.subr.mxu0 %v3524_v20  ;;  %1313 = vmatprep.subr.mxu1 %v3525_v22  ;;  %v3549_v20 = vld [vmem:[#allocation45_spill] sm:$0xff] }
 0x1cd   : > { %1237 = vmatpush1.msra.mxu0 %v3526_v24  ;;  %1314 = vmatpush1.msra.mxu1 %v3527_v26 }
 0x1ce   : > { %1238 = vmatprep.subr.mxu0 %v3528_v28  ;;  %1315 = vmatprep.subr.mxu1 %v3529_v30 }
 0x1cf   : > { %1239 = vmatpush1.msra.mxu0 %v3530_v32  ;;  %1316 = vmatpush1.msra.mxu1 %v3531_v34 }
 0x1d0   : > { %1240 = vmatprep.subr.mxu0 %v3532_v36  ;;  %1317 = vmatprep.subr.mxu1 %v3533_v38 }
 0x1d1   : > { %1241 = vmatpush1.msra.mxu0 %v3534_v40  ;;  %1318 = vmatpush1.msra.mxu1 %v3535_v5  ;;  %v3550_v40 = vld [vmem:[#allocation46_spill] sm:$0xff] }
 0x1d2   : > { %1242 = vmatprep.subr.mxu0 %v3536_v47  ;;  %1319 = vmatprep.subr.mxu1 %v3537_v60 }
 0x1d3   : > { %1243 = vmatpush1.msra.mxu0 %v3538_v7  ;;  %1320 = vmatpush1.msra.mxu1 %v3539_v46 }
 0x1d4   : > { %1244 = vmatprep.subr.mxu0 %v3540_v61  ;;  %1321 = vmatprep.subr.mxu1 %v3541_v37 }
 0x1d5   : > { %1245 = vmatpush1.msra.mxu0 %v3542_v59  ;;  %1322 = vmatpush1.msra.mxu1 %v3543_v2  ;;  %v3551_v59 = vld [vmem:[#allocation47_spill] sm:$0xff] }
 0x1d6   : > { %1246 = vmatprep.subr.mxu0 %v3544_v3  ;;  %1323 = vmatprep.subr.mxu1 %v3545_v48 }
 0x1d7   : > { %1247 = vmatpush1.msra.mxu0 %v3546_v14  ;;  %1280 = vmatprep.mubr.f32.mxu0 %v3520_v58 }
 0x1d8   : > { %1324 = vmatpush1.msra.mxu1 %v3547_v8  ;;  %1357 = vmatprep.mubr.f32.mxu1 %v3520_v58 }
 0x1d9   : > { %1438 = vmatprep.subr.mxu0 %v2309_v17  ;;  %1515 = vmatprep.subr.mxu1 %v3548_v54  ;;  %v3552_v17 = vld [vmem:[#allocation48_spill] sm:$0xff] }
 0x276   : > { %v1060_v16 = vpop.f32.mrf.mxu0  ;;  %v1137_v36 = vpop.f32.mrf.mxu1 }
 0x277   : > { %v1148_v24 = vadd.f32 %v1060_v16, %v3549_v20  ;;  %v1150_v16 = vadd.f32 %v1137_v36, %v3092_v56 }
 0x278   : > { %v1062_v28 = vpop.f32.mrf.mxu0  ;;  %v1139_v0 = vpop.f32.mrf.mxu1 }
 0x279   : > { %v1972_v32 = vmul.f32 -1.442695, %v1148_v24  ;;  %v1149_v47 = vadd.f32 %v1062_v28, %v3550_v40  ;;  %v1974_v28 = vmul.f32 -1.442695, %v1150_v16 }
 0x27a   : > { %v1066_v7 = vpop.f32.mrf.mxu0  ;;  %v1143_v20 = vpop.f32.mrf.mxu1 }
 0x27b   : > { %2208 = vpow2.f32 %v1972_v32  ;;  %v1973_v61 = vmul.f32 -1.442695, %v1149_v47  ;;  %v1152_v3 = vadd.f32 %v1066_v7, %v3551_v59  ;;  %v1154_v24 = vadd.f32 %v1143_v20, %v3096_v10 }
 0x27c   : > { %v1068_v14 = vpop.f32.mrf.mxu0  ;;  %v1151_v32 = vadd.f32 %v1139_v0, %v3094_v44  ;;  %v1145_v40 = vpop.f32.mrf.mxu1 }
 0x27d   : > { %2210 = vpow2.f32 %v1973_v61  ;;  %v1975_v19 = vmul.f32 -1.442695, %v1152_v3  ;;  %v1153_v12 = vadd.f32 %v1068_v14, %v3552_v17  ;;  %v1977_v7 = vmul.f32 -1.442695, %v1154_v24 }
 0x27e   : > { %v1155_v3 = vadd.f32 %v1145_v40, %v3098_v63 }
 0x27f   : > { %2212 = vpow2.f32 %v1975_v19  ;;  %v1976_v54 = vmul.f32 -1.442695, %v1153_v12 }
 0x281   : > { %2214 = vpow2.f32 %v1976_v54 }
 0x282   : > { %2216 = vpow2.f32 %v1974_v28 }
 0x283   : > { %2218 = vtanh.f32 %v1151_v32 }
 0x288   : > { %v2209_v47 = vpop.eup %2208 }
 0x289   : > { %v1174_v59 = vadd.f32 1.0, %v2209_v47 }
 0x28a   : > { %v2211_v61 = vpop.eup %2210 }
 0x28b   : > { %2220 = vrcp.f32 %v1174_v59  ;;  %v1175_v12 = vadd.f32 1.0, %v2211_v61 }
 0x28c   : > { %v2213_v19 = vpop.eup %2212  ;;  %2222 = vpow2.f32 %v1977_v7 }
 0x28d   : > { %2224 = vrcp.f32 %v1175_v12  ;;  %v1177_v56 = vadd.f32 1.0, %v2213_v19 }
 0x28e   : > { %v2215_v36 = vpop.eup %2214  ;;  %2226 = vtanh.f32 %v1155_v3 }
 0x28f   : > { %2228 = vrcp.f32 %v1177_v56  ;;  %v1178_v10 = vadd.f32 1.0, %v2215_v36  ;;  %v2217_v44 = vpop.eup %2216 }
 0x290   : > { %v2219_v0 = vpop.eup %2218  ;;  %v1176_v20 = vadd.f32 1.0, %v2217_v44  ;;  %v3555_v44 = vld [vmem:[#allocation51_spill] sm:$0xff] }
 0x291   : > { %2230 = vrcp.f32 %v1178_v10 }
 0x292   : > { %2232 = vrcp.f32 %v1176_v20 }
 0x298   : > { %v2221_v14 = vpop.eup %2220 }
 0x299   : > { %v2223_v17 = vpop.eup %2222  ;;  %v1196_v54 = vmul.f32 %v2221_v14, %v2219_v0 }
 0x29a   : > { %v2225_v16 = vpop.eup %2224  ;;  %v1179_v7 = vadd.f32 1.0, %v2223_v17 }
 0x29b   : > { %v2227_v24 = vpop.eup %2226  ;;  %v1194_v63 = vmul.f32 %v2225_v16, %v3116_v53 }
 0x29c   : > { %v2229_v28 = vpop.eup %2228 }
 0x29d   : > { %v3216_v32 = vadd.f32 %v1196_v54, %v1194_v63  ;;  %v1197_v40 = vmul.f32 %v2229_v28, %v2227_v24  ;;  %v3556_v54 = vld [vmem:[#allocation52_spill] sm:$0xff] }
 0x29e   : > { %v2231_v47 = vpop.eup %2230 }
 0x29f   : > { %2234 = vtanh.f32 %v3216_v32  ;;  %v1195_v59 = vmul.f32 %v2231_v47, %v3119_v42  ;;  %v2233_v3 = vpop.eup %2232 }
 0x2a0   : > { %2236 = vrcp.f32 %v1179_v7 }
 0x2a1   : > { %v3220_v61 = vadd.f32 %v1197_v40, %v1195_v59 }
 0x2a3   : > { %2238 = vtanh.f32 %v3220_v61 }
 0x2ac   : > { %v2235_v12 = vpop.eup %2234 }
 0x2ad   : > { %v3223_v19 = vmul.f32 %v2235_v12, %v2233_v3  ;;  %v2237_v53 = vpop.eup %2236 }
 0x2af   : > { %1281 = vmatmul.mubr.f32.vlgmr.msra.gmra.mxu0 %v3223_v19  ;;  %1358 = vmatmul.mubr.f32.vlgmr.msra.gmra.mxu1 %v3223_v19 }
 0x2b0   : > { %v2239_v56 = vpop.eup %2238  ;;  %1286 = vmatprep.mubr.f32.mxu0 %v3520_v58  ;;  %1363 = vmatprep.mubr.f32.mxu1 %v3520_v58 }
 0x2b1   : > { %v3229_v42 = vmul.f32 %v2239_v56, %v2237_v53  ;;  %1439 = vmatpush1.msra.mxu0 %v3130_v52  ;;  %1516 = vmatpush1.msra.mxu1 %v2895_v25  ;;  %v2310_v25 = vld [vmem:[#allocation10 + $0x188] sm:$0xff]  ;;  %v3557_v56 = vld [vmem:[#allocation57_spill] sm:$0xff] }
 0x2b2   : > { %1440 = vmatprep.subr.mxu0 %v3134_v21  ;;  %1517 = vmatprep.subr.mxu1 %v2898_v29  ;;  %v2311_v29 = vld [vmem:[#allocation10 + $0x180] sm:$0xff]  ;;  %v2312_v52 = vld [vmem:[#allocation10 + $0x168] sm:$0xff] }
 0x2b3   : > { %1287 = vmatmul.mubr.f32.gmra.mxu0 %v3229_v42  ;;  %1364 = vmatmul.mubr.f32.gmra.mxu1 %v3229_v42  ;;  %v2329_v21 = vld [vmem:[#allocation10 + $0x60] sm:$0xff] }
 0x2b4   : > { %1441 = vmatpush1.msra.mxu0 %v3140_v23  ;;  %1518 = vmatpush1.msra.mxu1 %v2903_v31  ;;  %v2313_v31 = vld [vmem:[#allocation10 + $0x160] sm:$0xff]  ;;  %v2330_v23 = vld [vmem:[#allocation10 + $0x48] sm:$0xff] }
 0x2b5   : > { %1442 = vmatprep.subr.mxu0 %v3144_v4  ;;  %1519 = vmatprep.subr.mxu1 %v2907_v33  ;;  %v2314_v33 = vld [vmem:[#allocation10 + $0x148] sm:$0xff]  ;;  %v2331_v4 = vld [vmem:[#allocation10 + $0x40] sm:$0xff] }
 0x2b6   : > { %1443 = vmatpush1.msra.mxu0 %v3148_v13  ;;  %1520 = vmatpush1.msra.mxu1 %v2910_v35  ;;  %v2315_v35 = vld [vmem:[#allocation10 + $0x140] sm:$0xff]  ;;  %v2332_v13 = vld [vmem:[#allocation10 + $0x28] sm:$0xff] }
 0x2b7   : > { %1444 = vmatprep.subr.mxu0 %v2310_v25  ;;  %1521 = vmatprep.subr.mxu1 %v2914_v39  ;;  %v2316_v39 = vld [vmem:[#allocation10 + $0x128] sm:$0xff] }
 0x2b8   : > { %1445 = vmatpush1.msra.mxu0 %v2311_v29  ;;  %1522 = vmatpush1.msra.mxu1 %v2919_v1  ;;  %v2317_v1 = vld [vmem:[#allocation10 + $0x120] sm:$0xff] }
 0x2b9   : > { %1446 = vmatprep.subr.mxu0 %v2312_v52  ;;  %1523 = vmatprep.subr.mxu1 %v2923_v41  ;;  %v2318_v41 = vld [vmem:[#allocation10 + $0x108] sm:$0xff] }
 0x2ba   : > { %1447 = vmatpush1.msra.mxu0 %v2313_v31  ;;  %1524 = vmatpush1.msra.mxu1 %v2926_v43  ;;  %v2319_v43 = vld [vmem:[#allocation10 + $0x100] sm:$0xff] }
 0x2bb   : > { %1448 = vmatprep.subr.mxu0 %v2314_v33  ;;  %1525 = vmatprep.subr.mxu1 %v2930_v45  ;;  %v2320_v45 = vld [vmem:[#allocation10 + $0xe8] sm:$0xff] }
 0x2bc   : > { %1449 = vmatpush1.msra.mxu0 %v2315_v35  ;;  %1526 = vmatpush1.msra.mxu1 %v2935_v15  ;;  %v2321_v15 = vld [vmem:[#allocation10 + $0xe0] sm:$0xff] }
 0x2bd   : > { %1450 = vmatprep.subr.mxu0 %v2316_v39  ;;  %1527 = vmatprep.subr.mxu1 %v2939_v49  ;;  %v2322_v49 = vld [vmem:[#allocation10 + $0xc8] sm:$0xff] }
 0x2be   : > { %1451 = vmatpush1.msra.mxu0 %v2317_v1  ;;  %1528 = vmatpush1.msra.mxu1 %v2942_v51  ;;  %v2323_v51 = vld [vmem:[#allocation10 + $0xc0] sm:$0xff] }
 0x2bf   : > { %1452 = vmatprep.subr.mxu0 %v2318_v41  ;;  %1529 = vmatprep.subr.mxu1 %v2946_v6  ;;  %v2324_v6 = vld [vmem:[#allocation10 + $0xa8] sm:$0xff] }
 0x2c0   : > { %1453 = vmatpush1.msra.mxu0 %v2319_v43  ;;  %1530 = vmatpush1.msra.mxu1 %v2951_v27  ;;  %v2325_v27 = vld [vmem:[#allocation10 + $0xa0] sm:$0xff] }
 0x2c1   : > { %1454 = vmatprep.subr.mxu0 %v2320_v45  ;;  %1531 = vmatprep.subr.mxu1 %v2955_v9  ;;  %v2326_v9 = vld [vmem:[#allocation10 + $0x88] sm:$0xff] }
 0x2c2   : > { %1455 = vmatpush1.msra.mxu0 %v2321_v15  ;;  %1532 = vmatpush1.msra.mxu1 %v2958_v55  ;;  %v2327_v55 = vld [vmem:[#allocation10 + $0x80] sm:$0xff] }
 0x2c3   : > { %1456 = vmatprep.subr.mxu0 %v2322_v49  ;;  %1533 = vmatprep.subr.mxu1 %v2962_v57  ;;  %v2328_v57 = vld [vmem:[#allocation10 + $0x68] sm:$0xff] }
 0x2c4   : > { %1457 = vmatpush1.msra.mxu0 %v2323_v51  ;;  %1534 = vmatpush1.msra.mxu1 %v3523_v18  ;;  %v2333_v18 = vld [vmem:[#allocation10 + $0x20] sm:$0xff] }
 0x2c5   : > { %1458 = vmatprep.subr.mxu0 %v2324_v6  ;;  %1535 = vmatprep.subr.mxu1 %v3525_v22  ;;  %v2334_v22 = vld [vmem:[#allocation10 + $0x8] sm:$0xff] }
 0x2c6   : > { %1459 = vmatpush1.msra.mxu0 %v2325_v27  ;;  %1536 = vmatpush1.msra.mxu1 %v3527_v26  ;;  %v2335_v26 = vld [vmem:[#allocation10] sm:$0xff] }
 0x2c7   : > { %1460 = vmatprep.subr.mxu0 %v2326_v9  ;;  %1537 = vmatprep.subr.mxu1 %v3529_v30  ;;  %v3271_v30 = vld [vmem:[#allocation11 + $0x78] sm:$0xff] }
 0x2c8   : > { %1461 = vmatpush1.msra.mxu0 %v2327_v55  ;;  %1538 = vmatpush1.msra.mxu1 %v3531_v34 }
 0x2c9   : > { %1462 = vmatprep.subr.mxu0 %v2328_v57  ;;  %1539 = vmatprep.subr.mxu1 %v3533_v38  ;;  %v3553_v38 = vld [vmem:[#allocation49_spill] sm:$0xff] }
 0x2ca   : > { %1463 = vmatpush1.msra.mxu0 %v2329_v21  ;;  %1540 = vmatpush1.msra.mxu1 %v3535_v5 }
 0x2cb   : > { %1464 = vmatprep.subr.mxu0 %v2330_v23  ;;  %1541 = vmatprep.subr.mxu1 %v3537_v60 }
 0x2cc   : > { %1465 = vmatpush1.msra.mxu0 %v2331_v4  ;;  %1542 = vmatpush1.msra.mxu1 %v3539_v46 }
 0x2cd   : > { %1466 = vmatprep.subr.mxu0 %v2332_v13  ;;  %1543 = vmatprep.subr.mxu1 %v3541_v37 }
 0x2ce   : > { %1467 = vmatpush1.msra.mxu0 %v2333_v18  ;;  %1544 = vmatpush1.msra.mxu1 %v3543_v2  ;;  %v3554_v2 = vld [vmem:[#allocation50_spill] sm:$0xff] }
 0x2cf   : > { %1468 = vmatprep.subr.mxu0 %v2334_v22  ;;  %1545 = vmatprep.subr.mxu1 %v3545_v48 }
 0x2d0   : > { %1469 = vmatpush1.msra.mxu0 %v2335_v26  ;;  %1502 = vmatprep.mubr.f32.mxu0 %v3520_v58  ;;  %v1675_v26 = vld [vmem:[#allocation11 + $0x60] sm:$0xff] }
 0x2d1   : > { %1546 = vmatpush1.msra.mxu1 %v3547_v8  ;;  %1579 = vmatprep.mubr.f32.mxu1 %v3520_v58 }
 0x2d2   : > { %2031 = vmatprep.subr.mxu0 %v3271_v30 }
 0x36f   : > { %v1282_v34 = vpop.f32.mrf.mxu0  ;;  %v1359_v37 = vpop.f32.mrf.mxu1 }
 0x370   : > { %v1370_v5 = vadd.f32 %v1282_v34, %v3553_v38  ;;  %v1372_v24 = vadd.f32 %v1359_v37, %v3100_v62  ;;  %v1674_v34 = vld [vmem:[#allocation11 + $0x58] sm:$0xff]  ;;  %v3558_v38 = vld [vmem:[#allocation62_spill] sm:$0xff]  ;;  %v1668_v37 = vld [vmem:[#allocation11 + $0x28] sm:$0xff] }
 0x371   : > { %v1284_v60 = vpop.f32.mrf.mxu0  ;;  %v1361_v14 = vpop.f32.mrf.mxu1 }
 0x372   : > { %v1980_v46 = vmul.f32 -1.442695, %v1370_v5  ;;  %v1371_v48 = vadd.f32 %v1284_v60, %v3554_v2  ;;  %v1982_v40 = vmul.f32 -1.442695, %v1372_v24  ;;  %v1373_v47 = vadd.f32 %v1361_v14, %v3102_v50  ;;  %v1672_v5 = vld [vmem:[#allocation11 + $0x48] sm:$0xff]  ;;  %v1670_v60 = vld [vmem:[#allocation11 + $0x38] sm:$0xff] }
 0x373   : > { %v1288_v36 = vpop.f32.mrf.mxu0  ;;  %v1365_v63 = vpop.f32.mrf.mxu1  ;;  %v1667_v2 = vld [vmem:[#allocation11 + $0x20] sm:$0xff]  ;;  %v3560_v14 = vld [vmem:[#allocation53_spill] sm:$0xff] }
 0x374   : > { %2240 = vpow2.f32 %v1980_v46  ;;  %v1981_v10 = vmul.f32 -1.442695, %v1371_v48  ;;  %v1374_v0 = vadd.f32 %v1288_v36, %v3555_v44  ;;  %v1376_v28 = vadd.f32 %v1365_v63, %v3104_v11  ;;  %v1669_v46 = vld [vmem:[#allocation11 + $0x30] sm:$0xff]  ;;  %v1666_v48 = vld [vmem:[#allocation11 + $0x18] sm:$0xff]  ;;  %v1663_v44 = vld [vmem:[#allocation11] sm:$0xff] }
 0x375   : > { %v1290_v8 = vpop.f32.mrf.mxu0  ;;  %v1367_v7 = vpop.f32.mrf.mxu1  ;;  %v1665_v36 = vld [vmem:[#allocation11 + $0x10] sm:$0xff]  ;;  %v3561_v24 = vld [vmem:[#allocation54_spill] sm:$0xff] }
 0x376   : > { %2242 = vpow2.f32 %v1981_v10  ;;  %v1983_v17 = vmul.f32 -1.442695, %v1374_v0  ;;  %v1375_v16 = vadd.f32 %v1290_v8, %v3556_v54  ;;  %v1985_v3 = vmul.f32 -1.442695, %v1376_v28  ;;  %v1664_v10 = vld [vmem:[#allocation11 + $0x8] sm:$0xff] }
 0x377   : > { %v1377_v25 = vadd.f32 %v1367_v7, %v3557_v56  ;;  %v3559_v0 = vld [vmem:[#allocation63_spill] sm:$0xff] }
 0x378   : > { %2244 = vpow2.f32 %v1983_v17  ;;  %v1984_v20 = vmul.f32 -1.442695, %v1375_v16 }
 0x37a   : > { %2246 = vpow2.f32 %v1984_v20 }
 0x37b   : > { %2248 = vpow2.f32 %v1982_v40 }
 0x37c   : > { %2250 = vtanh.f32 %v1373_v47  ;;  %v3562_v47 = vld [vmem:[#allocation55_spill] sm:$0xff] }
 0x381   : > { %v2241_v59 = vpop.eup %2240 }
 0x382   : > { %v1396_v12 = vadd.f32 1.0, %v2241_v59 }
 0x383   : > { %v2243_v53 = vpop.eup %2242 }
 0x384   : > { %2252 = vrcp.f32 %v1396_v12  ;;  %v1397_v29 = vadd.f32 1.0, %v2243_v53  ;;  %v3563_v53 = vld [vmem:[#allocation56_spill] sm:$0xff] }
 0x385   : > { %v2245_v52 = vpop.eup %2244  ;;  %2254 = vpow2.f32 %v1985_v3 }
 0x386   : > { %2256 = vrcp.f32 %v1397_v29  ;;  %v1399_v62 = vadd.f32 1.0, %v2245_v52  ;;  %v3564_v29 = vld [vmem:[#allocation58_spill] sm:$0xff] }
 0x387   : > { %v2247_v31 = vpop.eup %2246  ;;  %2258 = vtanh.f32 %v1377_v25 }
 0x388   : > { %2260 = vrcp.f32 %v1399_v62  ;;  %v1400_v11 = vadd.f32 1.0, %v2247_v31  ;;  %v2249_v50 = vpop.eup %2248  ;;  %v3565_v31 = vld [vmem:[#allocation60_spill] sm:$0xff] }
 0x389   : > { %v2251_v33 = vpop.eup %2250  ;;  %v1398_v43 = vadd.f32 1.0, %v2249_v50 }
 0x38a   : > { %2262 = vrcp.f32 %v1400_v11 }
 0x38b   : > { %2264 = vrcp.f32 %v1398_v43 }
 0x391   : > { %v2253_v35 = vpop.eup %2252 }
 0x392   : > { %v2255_v39 = vpop.eup %2254  ;;  %v1418_v1 = vmul.f32 %v2253_v35, %v2251_v33  ;;  %v3566_v33 = vld [vmem:[#allocation59_spill] sm:$0xff] }
 0x393   : > { %v2257_v41 = vpop.eup %2256  ;;  %v1401_v9 = vadd.f32 1.0, %v2255_v39 }
 0x394   : > { %v2259_v45 = vpop.eup %2258  ;;  %v1416_v15 = vmul.f32 %v2257_v41, %v3216_v32  ;;  %v1677_v32 = vld [vmem:[#allocation11 + $0x70] sm:$0xff] }
 0x395   : > { %v2261_v49 = vpop.eup %2260 }
 0x396   : > { %v3283_v51 = vadd.f32 %v1418_v1, %v1416_v15  ;;  %v1419_v6 = vmul.f32 %v2261_v49, %v2259_v45  ;;  %v3567_v15 = vld [vmem:[#allocation61_spill] sm:$0xff] }
 0x397   : > { %v2263_v27 = vpop.eup %2262 }
 0x398   : > { %2266 = vtanh.f32 %v3283_v51  ;;  %v1417_v55 = vmul.f32 %v2263_v27, %v3220_v61  ;;  %v2265_v21 = vpop.eup %2264  ;;  %v1676_v61 = vld [vmem:[#allocation11 + $0x68] sm:$0xff] }
 0x399   : > { %2268 = vrcp.f32 %v1401_v9 }
 0x39a   : > { %v3287_v57 = vadd.f32 %v1419_v6, %v1417_v55 }
 0x39c   : > { %2270 = vtanh.f32 %v3287_v57 }
 0x3a5   : > { %v2267_v23 = vpop.eup %2266 }
 0x3a6   : > { %v3290_v4 = vmul.f32 %v2267_v23, %v2265_v21  ;;  %v2269_v13 = vpop.eup %2268  ;;  %v3318_v23 = vld [vmem:[%s3404_s5] ss:$0 sm:$0xff] }
 0x3a8   : > { %1503 = vmatmul.mubr.f32.vlgmr.msra.gmra.mxu0 %v3290_v4  ;;  %1580 = vmatmul.mubr.f32.vlgmr.msra.gmra.mxu1 %v3290_v4 }
 0x3a9   : > { %v2271_v18 = vpop.eup %2270  ;;  %2032 = vmatpush3.msra.mxu0 %v3271_v30  ;;  %1508 = vmatprep.mubr.f32.mxu0 %v3520_v58  ;;  %v1673_v30 = vld [vmem:[#allocation11 + $0x50] sm:$0xff] }
 0x3aa   : > { %2033 = vmatprep.subr.mxu0 %v1677_v32  ;;  %1585 = vmatprep.mubr.f32.mxu1 %v3520_v58  ;;  %v3297_v22 = vmul.f32 %v2271_v18, %v2269_v13  ;;  %v1671_v58 = vld [vmem:[#allocation11 + $0x40] sm:$0xff] }
 0x3ab   : > { %2034 = vmatpush3.msra.mxu0 %v1677_v32 }
 0x3ac   : > { %2035 = vmatprep.subr.mxu0 %v1676_v61  ;;  %1509 = vmatmul.mubr.f32.gmra.mxu0 %v3297_v22 }
 0x3ad   : > { %1586 = vmatmul.mubr.f32.gmra.mxu1 %v3297_v22  ;;  %2036 = vmatpush3.msra.mxu0 %v1676_v61 }
 0x3ae   : > { %2037 = vmatprep.subr.mxu0 %v1675_v26  ;;  %2063 = vmatprep.mubr.f32.mxu0 %v3558_v38 }
 0x3af   : > { %2038 = vmatpush3.msra.mxu0 %v1675_v26 }
 0x3b0   : > { %2039 = vmatprep.subr.mxu0 %v1674_v34 }
 0x3b1   : > { %2040 = vmatpush3.msra.mxu0 %v1674_v34 }
 0x3b2   : > { %2041 = vmatprep.subr.mxu0 %v1673_v30 }
 0x3b3   : > { %2042 = vmatpush3.msra.mxu0 %v1673_v30 }
 0x3b4   : > { %2043 = vmatprep.subr.mxu0 %v1672_v5 }
 0x3b5   : > { %2044 = vmatpush3.msra.mxu0 %v1672_v5 }
 0x3b6   : > { %2045 = vmatprep.subr.mxu0 %v1671_v58 }
 0x3b7   : > { %2046 = vmatpush3.msra.mxu0 %v1671_v58 }
 0x3b8   : > { %2047 = vmatprep.subr.mxu0 %v1670_v60 }
 0x3b9   : > { %2048 = vmatpush3.msra.mxu0 %v1670_v60 }
 0x3ba   : > { %2049 = vmatprep.subr.mxu0 %v1669_v46 }
 0x3bb   : > { %2050 = vmatpush3.msra.mxu0 %v1669_v46 }
 0x3bc   : > { %2051 = vmatprep.subr.mxu0 %v1668_v37 }
 0x3bd   : > { %2052 = vmatpush3.msra.mxu0 %v1668_v37 }
 0x3be   : > { %2053 = vmatprep.subr.mxu0 %v1667_v2 }
 0x3bf   : > { %2054 = vmatpush3.msra.mxu0 %v1667_v2 }
 0x3c0   : > { %2055 = vmatprep.subr.mxu0 %v1666_v48 }
 0x3c1   : > { %2056 = vmatpush3.msra.mxu0 %v1666_v48 }
 0x3c2   : > { %2057 = vmatprep.subr.mxu0 %v1665_v36 }
 0x3c3   : > { %2058 = vmatpush3.msra.mxu0 %v1665_v36 }
 0x3c4   : > { %2059 = vmatprep.subr.mxu0 %v1664_v10 }
 0x3c5   : > { %2060 = vmatpush3.msra.mxu0 %v1664_v10 }
 0x3c6   : > { %2061 = vmatprep.subr.mxu0 %v1663_v44 }
 0x3c7   : > { %2062 = vmatpush3.msra.mxu0 %v1663_v44 }
 0x3c8   : > { %2064 = vmatmul.mubr.f32.vlgmr.msra.gmra.mxu0 %v3559_v0 }
 0x3c9   : > { %2066 = vmatprep.mubr.f32.mxu0 %v3223_v19 }
 0x3cc   : > { %2067 = vmatmul.mubr.f32.gmra.mxu0 %v3229_v42 }
 0x3cd   : > { %2069 = vmatprep.mubr.f32.mxu0 %v3290_v4 }
 0x3d0   : > { %2070 = vmatmul.mubr.f32.gmra.mxu0 %v3297_v22 }
 0x468   : > { %v1504_v8 = vpop.f32.mrf.mxu0  ;;  %v1581_v20 = vpop.f32.mrf.mxu1 }
 0x469   : > { %v1592_v17 = vadd.f32 %v1504_v8, %v3560_v14  ;;  %v1594_v52 = vadd.f32 %v1581_v20, %v3564_v29 }
 0x46a   : > { %v1506_v54 = vpop.f32.mrf.mxu0  ;;  %v1583_v3 = vpop.f32.mrf.mxu1 }
 0x46b   : > { %v1988_v16 = vmul.f32 -1.442695, %v1592_v17  ;;  %v1593_v63 = vadd.f32 %v1506_v54, %v3561_v24  ;;  %v1990_v50 = vmul.f32 -1.442695, %v1594_v52  ;;  %v1595_v35 = vadd.f32 %v1583_v3, %v3566_v33 }
 0x46c   : > { %v1510_v28 = vpop.f32.mrf.mxu0 }
 0x46d   : > { %2272 = vpow2.f32 %v1988_v16  ;;  %v1989_v40 = vmul.f32 -1.442695, %v1593_v63  ;;  %v1596_v7 = vadd.f32 %v1510_v28, %v3562_v47  ;;  %v1587_v62 = vpop.f32.mrf.mxu1 }
 0x46e   : > { %v1512_v59 = vpop.f32.mrf.mxu0  ;;  %v1598_v11 = vadd.f32 %v1587_v62, %v3565_v31 }
 0x46f   : > { %2274 = vpow2.f32 %v1989_v40  ;;  %v1991_v12 = vmul.f32 -1.442695, %v1596_v7  ;;  %v1597_v56 = vadd.f32 %v1512_v59, %v3563_v53  ;;  %v1589_v39 = vpop.f32.mrf.mxu1 }
 0x470   : > { %v1993_v41 = vmul.f32 -1.442695, %v1598_v11  ;;  %v1599_v49 = vadd.f32 %v1589_v39, %v3567_v15 }
 0x471   : > { %2276 = vpow2.f32 %v1991_v12  ;;  %v1992_v25 = vmul.f32 -1.442695, %v1597_v56 }
 0x473   : > { %2278 = vpow2.f32 %v1992_v25 }
 0x474   : > { %2280 = vpow2.f32 %v1990_v50 }
 0x475   : > { %2282 = vtanh.f32 %v1595_v35 }
 0x47a   : > { %v2273_v1 = vpop.eup %2272 }
 0x47b   : > { %v1618_v43 = vadd.f32 1.0, %v2273_v1 }
 0x47c   : > { %v2275_v45 = vpop.eup %2274 }
 0x47d   : > { %2284 = vrcp.f32 %v1618_v43  ;;  %v1619_v6 = vadd.f32 1.0, %v2275_v45 }
 0x47e   : > { %v2277_v27 = vpop.eup %2276  ;;  %2286 = vpow2.f32 %v1993_v41 }
 0x47f   : > { %2288 = vrcp.f32 %v1619_v6  ;;  %v1621_v9 = vadd.f32 1.0, %v2277_v27 }
 0x480   : > { %v2279_v55 = vpop.eup %2278  ;;  %2290 = vtanh.f32 %v1599_v49 }
 0x481   : > { %2292 = vrcp.f32 %v1621_v9  ;;  %v1622_v21 = vadd.f32 1.0, %v2279_v55  ;;  %v2281_v32 = vpop.eup %2280 }
 0x482   : > { %v2283_v18 = vpop.eup %2282  ;;  %v1620_v37 = vadd.f32 1.0, %v2281_v32 }
 0x483   : > { %2294 = vrcp.f32 %v1622_v21 }
 0x484   : > { %2296 = vrcp.f32 %v1620_v37 }
 0x488   : > { %v2065_v13 = vpop.f32.mrf.mxu0 }
 0x489   : > { %v1758_v61 = vadd.f32 %v2065_v13, %v3318_v23 }
 0x48a   : > { %v2285_v26 = vpop.eup %2284  ;;  %v1752_v34 = vpop.f32.mrf.mxu0 }
 0x48b   : > { %v2287_v30 = vpop.eup %2286  ;;  %v1640_v5 = vmul.f32 %v2285_v26, %v2283_v18  ;;  %v1792_v58 = vmax.f32 %v1758_v61, 0.0  ;;  %v1753_v60 = vadd.f32 %v3318_v23, %v1752_v34 }
 0x48c   : > { %v2289_v46 = vpop.eup %2288  ;;  %v2068_v2 = vpop.f32.mrf.mxu0  ;;  %v1623_v28 = vadd.f32 1.0, %v2287_v30 }
 0x48d   : > { %v2291_v48 = vpop.eup %2290  ;;  %v1638_v36 = vmul.f32 %v2289_v46, %v3283_v51  ;;  %v1800_v10 = vadd.f32 %v1792_v58, %v3559_v0  ;;  %v1791_v44 = vmax.f32 %v1753_v60, 0.0  ;;  %v1768_v8 = vadd.f32 %v2068_v2, %v3318_v23 }
 0x48e   : > { %v2293_v14 = vpop.eup %2292  ;;  %v1762_v17 = vpop.f32.mrf.mxu0 }
 0x48f   : > { %v1642_v54 = vadd.f32 %v1640_v5, %v1638_v36  ;;  %v1641_v16 = vmul.f32 %v2293_v14, %v2291_v48  ;;  %1808 = vst [vmem:[%s2734_s1 + $0x8] sm:$0xff] %v1800_v10  ;;  %v1799_v20 = vadd.f32 %v1791_v44, %v3558_v38  ;;  %v1794_v24 = vmax.f32 %v1768_v8, 0.0 }
 0x490   : > { %v2295_v63 = vpop.eup %2294  ;;  %v1763_v51 = vadd.f32 %v3318_v23, %v1762_v17  ;;  %v2071_v40 = vpop.f32.mrf.mxu0 }
 0x491   : > { %2298 = vtanh.f32 %v1642_v54  ;;  %1653 = vst [vmem:[#allocation4 + $0x8] sm:$0xff] %v1642_v54  ;;  %v1639_v0 = vmul.f32 %v2295_v63, %v3287_v57  ;;  %1807 = vst [vmem:[%s2734_s1] sm:$0xff] %v1799_v20  ;;  %v1802_v47 = vadd.f32 %v1794_v24, %v3229_v42  ;;  %v1778_v7 = vadd.f32 %v2071_v40, %v3318_v23  ;;  %v2297_v29 = vpop.eup %2296 }
 0x492   : > { %v1793_v38 = vmax.f32 %v1763_v51, 0.0  ;;  %v1772_v59 = vpop.f32.mrf.mxu0  ;;  %2300 = vrcp.f32 %v1623_v28 }
 0x493   : > { %v1643_v3 = vadd.f32 %v1641_v16, %v1639_v0  ;;  %1810 = vst [vmem:[%s2734_s1 + $0x18] sm:$0xff] %v1802_v47  ;;  %v1796_v12 = vmax.f32 %v1778_v7, 0.0  ;;  %v1773_v53 = vadd.f32 %v3318_v23, %v1772_v59 }
 0x494   : > { %v1801_v56 = vadd.f32 %v1793_v38, %v3223_v19 }
 0x495   : > { %2302 = vtanh.f32 %v1643_v3  ;;  %1654 = vst [vmem:[#allocation4] sm:$0xff] %v1643_v3  ;;  %v1804_v57 = vadd.f32 %v1796_v12, %v3297_v22  ;;  %v1795_v25 = vmax.f32 %v1773_v53, 0.0 }
 0x496   : > { %1809 = vst [vmem:[%s2734_s1 + $0x10] sm:$0xff] %v1801_v56 }
 0x497   : > { %1812 = vst [vmem:[%s2734_s1 + $0x28] sm:$0xff] %v1804_v57  ;;  %v1803_v42 = vadd.f32 %v1795_v25, %v3290_v4 }
 0x499   : > { %1811 = vst [vmem:[%s2734_s1 + $0x20] sm:$0xff] %v1803_v42 }
 0x49e   : > { %v2299_v52 = vpop.eup %2298 }
 0x49f   : > { %v1646_v62 = vmul.f32 %v2299_v52, %v2297_v29  ;;  %v2301_v31 = vpop.eup %2300 }
 0x4a1   : > { %1651 = vst [vmem:[#allocation3] sm:$0xff] %v1646_v62  ;;  %2072 = vmatprep.mubr.f32.mxu0 %v1646_v62 }
 0x4a2   : > { %v2303_v19 = vpop.eup %2302 }
 0x4a3   : > { %v1647_v11 = vmul.f32 %v2303_v19, %v2301_v31 }
 0x4a5   : > { %1652 = vst [vmem:[#allocation3 + $0x8] sm:$0xff] %v1647_v11  ;;  %2073 = vmatmul.mubr.f32.gmra.mxu0 %v1647_v11 }
 0x565   : > { %v2074_v22 = vpop.f32.mrf.mxu0 }
 0x566   : > { %v1788_v50 = vadd.f32 %v2074_v22, %v3318_v23 }
 0x567   : > { %v1782_v4 = vpop.f32.mrf.mxu0 }
 0x568   : > { %v1798_v33 = vmax.f32 %v1788_v50, 0.0  ;;  %v1783_v35 = vadd.f32 %v3318_v23, %v1782_v4 }
 0x56a   : > { %v1806_v39 = vadd.f32 %v1798_v33, %v1647_v11  ;;  %v1797_v1 = vmax.f32 %v1783_v35, 0.0 }
 0x56c   : > { %1814 = vst [vmem:[%s2734_s1 + $0x38] sm:$0xff] %v1806_v39  ;;  %v1805_v41 = vadd.f32 %v1797_v1, %v1646_v62 }
 0x56e   : > { %1813 = vst [vmem:[%s2734_s1 + $0x30] sm:$0xff] %v1805_v41 }
 0x56f   : > { %2455 = shalt.err (!%p2452_p1)
}
 0x570   : > { %s2456_s18 = scalar_lea.hbm %s3347_s10, 1024  ;;  %s2460_s7 = scalar_lea.hbm %s3405_s6, 2048 }
 0x571   : > { %p2457_p4 = scmp.ne.s32.totalorder %s3347_s10, %s2456_s18  ;;  %p2461_p5 = scmp.lt.s32.totalorder %s3347_s10, %s3405_s6 }
 0x572   : > { %p2462_p3 = scmp.lt.s32.totalorder %s2460_s7, %s2456_s18 }
 0x573   : > { %p2458_p8 = pnand %p2457_p4, %p2683_p0 }
 0x574   : > { %p2463_p10 = por %p2462_p3, %p2461_p5 }
 0x575   : > { %p2459_p12 = pneg %p2458_p8 }
 0x577   : > { %p2464_p2 = pnand %p2463_p10, %p2459_p12 }
 0x579   : > { %2467 = shalt.err (!%p2464_p2)
}
 0x57a   : > { %s2543_s14 = smov 128   ;;  %s2544_s28 = smov 8  }
 0x57b   : > { %2089 = dma.vmem_to_hbm [thread:$0]  (%p2683_p0), %s3349_s30, 1024, %s3347_s10, %s1816_s16, %s2543_s14, %s2543_s14, %s2544_s28  }
 0x57c PF: > { %s1847_s19 = sand.u32 1, %s2510_s21   ;;  %p3568_p11 = scmp.ne.s32.totalorder %s3463_s8, 0 }
 0x57d   : > { %p3569_p7 = scmp.ge.s32.totalorder %s2530_s26, 2  ;;  %s1848_s11 = scalar_lea.sflag [#allocation7], %s1847_s19 }
 0x57f   : > { %p2106_p6 = pnand %p3569_p7, %p3568_p11 }
 0x581   : > { %p2107_p9 = pneg %p2106_p6 }
 0x583   : > { %2505 = dma.done.wait (%p2107_p9), %s1848_s11, 1024  }
 0x584   : > { %2507 = vsyncadd (%p2107_p9), %s1848_s11, 4294966272  ;;  %s24_s26 = sadd.s32 1, %s2530_s26   ;;  %s3570_s21 = smov %s2514_s22 }
 0x585   : > { %p21_p13 = scmp.ge.s32.totalorder %s24_s26, 4   ;;  %s3571_s22 = smov %s2518_s23 }
 0x586   : > { %s3572_s23 = smov %s2695_s13  ;;  %s3573_s24 = smov %s2526_s25 }
 0x587   : > { %s3574_s25 = smov %s3576_s20  ;;  %23 = sbr.rel (!%p21_p13) target bundleno = 11 (0xb), region = 111 }
 0x58c   :  { %1853 = vsyncpa [#allocation6], 1 }
 0x58d   :  { %1855 = vsyncpa [#allocation6 + $0x1], 1 }
 0x58e   :  { %1856 = vsyncpa [#allocation9], 1 }
 0x58f   :  { %1857 = vsyncpa [#allocation12], 1 }
 0x590   :  { %1858 = vsyncpa [#allocation7], 1 }
 0x591   :  { %1860 = vsyncpa [#allocation7 + $0x1], 1 }

</bundles_post_ra>
